<compile_context>
chip_gen: v7x
topology: tpu7x:2x2x1
jax: 0.10.0
libtpu: 0.0.40
codegen_flags: <defaults>
</compile_context>

<pallas_src>
import jax
import jax.numpy as jnp
import numpy as np
from jax.experimental import pallas as pl
from jax.experimental.pallas import tpu as pltpu


_LANE = 128     # final logits padded to a lane-dense width
_FC1_NP = 64    # fc1 output width padded 50 -> 64 (also fc2's K)
_KH = 5         # conv kernel size
_C1, _C2 = 10, 20


def _round_up(v, m):
    return -(-v // m) * m


def _pad2d(m, rows, cols):
    r, c = m.shape
    if (r, c) == (rows, cols):
        return m
    return jnp.pad(m, ((0, rows - r), (0, cols - c)))


# ----------------------------------------------------------------------------
# In-kernel helpers
# ----------------------------------------------------------------------------
def _max_pool_2x2(z, c):
    """2x2 / stride-2 max pool of a conv output stored as (H, W*c), where the
    lane index is w*c + channel.  Only static slices + maxima + concats."""
    h2, wc2 = z.shape
    oh, ow = h2 // 2, wc2 // (2 * c)
    # width (lane) direction: pairwise max of adjacent channel groups
    cols = [jnp.maximum(z[:, (2 * j) * c:(2 * j + 1) * c],
                        z[:, (2 * j + 1) * c:(2 * j + 2) * c])
            for j in range(ow)]
    zw = jnp.concatenate(cols, axis=1)                       # (2*oh, ow*c)
    # height (sublane) direction: pairwise max of adjacent rows
    rows = [jnp.maximum(zw[2 * i:2 * i + 1, :], zw[2 * i + 1:2 * i + 2, :])
            for i in range(oh)]
    return jnp.concatenate(rows, axis=0)                     # (oh, ow*c)


def _cnn_kernel(x_ref, wb1_ref, b1_ref, wb2_ref, b2_ref,
                wf1_ref, bf1_ref, wf2_ref, bf2_ref, out_ref):
    """Whole forward for a block of `bt` images.

    Layout convention for activations: 2-D (image rows, W*C lanes).
    Banded conv weights wbX_ref[dh] have shape (W_in*Cin, W_out*Cout), so a
    conv layer is a sum of 5 matmuls over sublane-shifted input slices.
    """
    bt = x_ref.shape[0]
    cdt = wb1_ref.dtype                      # MXU dtype (bf16 by default)

    feats = []
    for b in range(bt):
        # ---- conv1: 28x28x1 -> 24x24x10 (5 banded matmuls, f32 accumulation)
        o1 = None
        for dh in range(_KH):
            lhs = x_ref[b, dh:dh + 24, :].astype(cdt)        # (24, 28)
            t = jnp.dot(lhs, wb1_ref[dh],
                        preferred_element_type=jnp.float32)  # (24, 240)
            o1 = t if o1 is None else o1 + t
        # bias is per-channel => adding after the max pool is exact
        z1 = _max_pool_2x2(o1, _C1) + b1_ref[...]            # (12, 120) f32

        # ---- conv2: 12x12x10 -> 8x8x20
        zc = z1.astype(cdt)
        o2 = None
        for dh in range(_KH):
            t = jnp.dot(zc[dh:dh + 8, :], wb2_ref[dh],
                        preferred_element_type=jnp.float32)  # (8, 160)
            o2 = t if o2 is None else o2 + t
        # TODO(synk): nn.Dropout2d is stochastic; applied as identity (eval mode).
        z2 = _max_pool_2x2(o2, _C2) + b2_ref[...]            # (4, 80) f32

        # flatten in (h, w, c) order -> (1, 320); fc1's K axis was permuted
        # offline to match this order exactly.
        feats.append(jnp.concatenate([z2[i:i + 1, :] for i in range(4)],
                                     axis=1))                # (1, 320)

    f = feats[0] if bt == 1 else jnp.concatenate(feats, axis=0)   # (bt, 320)

    # ---- fused fc1 -> fc2 (no nonlinearity in the reference module)
    h = jnp.dot(f.astype(cdt), wf1_ref[...],
                preferred_element_type=jnp.float32) + bf1_ref[...]    # (bt, 64)
    y = jnp.dot(h.astype(cdt), wf2_ref[...],
                preferred_element_type=jnp.float32) + bf2_ref[...]    # (bt, 128)

    out_ref[...] = y.reshape(1, bt, y.shape[-1]).astype(out_ref.dtype)


# ----------------------------------------------------------------------------
# Parameters
# ----------------------------------------------------------------------------
def init_params(output_size=10):
    key = jax.random.PRNGKey(42)
    ks = jax.random.split(key, 8)
    return {
        "conv1_w": 0.1 * jax.random.normal(ks[0], (10, 1, 5, 5), jnp.float32),
        "conv1_b": 0.1 * jax.random.normal(ks[1], (10,), jnp.float32),
        "conv2_w": 0.1 * jax.random.normal(ks[2], (20, 10, 5, 5), jnp.float32),
        "conv2_b": 0.1 * jax.random.normal(ks[3], (20,), jnp.float32),
        "fc1_w": 0.1 * jax.random.normal(ks[4], (50, 320), jnp.float32),  # (out, in)
        "fc1_b": 0.1 * jax.random.normal(ks[5], (50,), jnp.float32),
        "fc2_w": 0.1 * jax.random.normal(ks[6], (output_size, 50), jnp.float32),
        "fc2_b": 0.1 * jax.random.normal(ks[7], (output_size,), jnp.float32),
    }


def _banded_conv_weight(w_oihw, in_w):
    """(Cout, Cin, KH, KW) -> (KH, in_w*Cin, out_w*Cout) banded matrices so that
    conv == sum_dh  X[dh:dh+out_h, :] @ Wb[dh]  in the (rows, W*C lanes) layout."""
    co, ci, kh, kw = w_oihw.shape
    ow = in_w - kw + 1
    wb = np.zeros((kh, in_w * ci, ow * co), np.float32)
    w_np = np.asarray(w_oihw, np.float32)
    for dh in range(kh):
        for j in range(ow):
            for dw in range(kw):
                wp = j + dw
                wb[dh, wp * ci:(wp + 1) * ci, j * co:(j + 1) * co] = \
                    w_np[:, :, dh, dw].T
    return wb


def prepare_params(params, *, mxu_dtype=jnp.bfloat16):
    """One-time transform of the PyTorch-layout params into kernel operands.

    All weight permutations / banding / zero padding (including the NCHW
    flatten permutation consumed by fc1) are hoisted here.  mxu_dtype=bfloat16
    is the recommended default on v5e/v6e/v7x; pass jnp.float32 for an exact
    parity path.  Biases stay f32 (added on the VPU after f32 accumulation).
    """
    wb1 = jnp.asarray(_banded_conv_weight(params["conv1_w"], 28), mxu_dtype)  # (5, 28, 240)
    wb2 = jnp.asarray(_banded_conv_weight(params["conv2_w"], 12), mxu_dtype)  # (5, 120, 160)
    b1 = jnp.tile(params["conv1_b"].astype(jnp.float32), 12).reshape(1, 120)
    b2 = jnp.tile(params["conv2_b"].astype(jnp.float32), 4).reshape(1, 80)

    # fc1 consumes the in-kernel (h, w, c) flatten; permute its K axis from
    # PyTorch's NCHW view(-1, 320) order (c, h, w) once, offline.
    wf1 = jnp.transpose(params["fc1_w"].reshape(-1, 20, 4, 4),
                        (2, 3, 1, 0)).reshape(320, -1)                        # (320, 50)
    wf1 = _pad2d(wf1, 320, _FC1_NP).astype(mxu_dtype)                         # (320, 64)
    bf1 = _pad2d(params["fc1_b"].reshape(1, -1), 1, _FC1_NP).astype(jnp.float32)

    out_sz = params["fc2_w"].shape[0]
    np2 = _round_up(out_sz, _LANE)                                            # 128
    wf2 = _pad2d(params["fc2_w"].T, _FC1_NP, np2).astype(mxu_dtype)           # (64, 128)
    bf2 = _pad2d(params["fc2_b"].reshape(1, -1), 1, np2).astype(jnp.float32)

    return {"wb1": wb1, "b1": b1, "wb2": wb2, "b2": b2,
            "wf1": wf1, "bf1": bf1, "wf2": wf2, "bf2": bf2}


# ----------------------------------------------------------------------------
# Forward wrapper
# ----------------------------------------------------------------------------
def _choose_block_batch(batch):
    # >=2 grid steps whenever batch >= 2 (keeps both v7x TensorCores busy),
    # up to 8 images unrolled per grid step for larger batches.
    if batch <= 1:
        return 1
    return max(1, min(8, batch // 2))


def cnn_forward(prep, x_nchw, *, output_size=10):
    """x_nchw: (B, 1, 28, 28) f32 -> (B, output_size) f32 (PyTorch CNN, eval)."""
    batch = x_nchw.shape[0]
    assert x_nchw.shape[1:] == (1, 28, 28), x_nchw.shape
    np2 = prep["wf2"].shape[1]

    bt = _choose_block_batch(batch)
    g = -(-batch // bt)
    bp = g * bt
    x = x_nchw.reshape(batch, 28, 28)
    if bp != batch:
        x = jnp.pad(x, ((0, bp - batch), (0, 0), (0, 0)))

    out = pl.pallas_call(
        _cnn_kernel,
        out_shape=jax.ShapeDtypeStruct((g, bt, np2), jnp.float32),
        grid=(g,),
        in_specs=[
            pl.BlockSpec((bt, 28, 28), lambda i: (i, 0, 0)),
            pl.BlockSpec(prep["wb1"].shape, lambda i: (0, 0, 0)),
            pl.BlockSpec(prep["b1"].shape, lambda i: (0, 0)),
            pl.BlockSpec(prep["wb2"].shape, lambda i: (0, 0, 0)),
            pl.BlockSpec(prep["b2"].shape, lambda i: (0, 0)),
            pl.BlockSpec(prep["wf1"].shape, lambda i: (0, 0)),
            pl.BlockSpec(prep["bf1"].shape, lambda i: (0, 0)),
            pl.BlockSpec(prep["wf2"].shape, lambda i: (0, 0)),
            pl.BlockSpec(prep["bf2"].shape, lambda i: (0, 0)),
        ],
        out_specs=pl.BlockSpec((1, bt, np2), lambda i: (i, 0, 0)),
        compiler_params=pltpu.CompilerParams(
            dimension_semantics=("parallel",)),
    )(x, prep["wb1"], prep["b1"], prep["wb2"], prep["b2"],
      prep["wf1"], prep["bf1"], prep["wf2"], prep["bf2"])

    return out.reshape(bp, np2)[:batch, :output_size]


# ----------------------------------------------------------------------------
# Pure-XLA reference (no Pallas) for a sanity check
# ----------------------------------------------------------------------------
def _reference_forward(params, x_nchw):
    def conv(x, w, b):
        y = jax.lax.conv_general_dilated(
            x, w, window_strides=(1, 1), padding="VALID",
            dimension_numbers=("NCHW", "OIHW", "NCHW"),
            precision=jax.lax.Precision.HIGHEST)
        return y + b.reshape(1, -1, 1, 1)

    def pool(x):
        return jax.lax.reduce_window(x, -jnp.inf, jax.lax.max,
                                     (1, 1, 2, 2), (1, 1, 2, 2), "VALID")

    x = pool(conv(x_nchw, params["conv1_w"], params["conv1_b"]))
    x = pool(conv(x, params["conv2_w"], params["conv2_b"]))
    x = x.reshape(x.shape[0], -1)
    x = jnp.dot(x, params["fc1_w"].T,
                precision=jax.lax.Precision.HIGHEST) + params["fc1_b"]
    x = jnp.dot(x, params["fc2_w"].T,
                precision=jax.lax.Precision.HIGHEST) + params["fc2_b"]
    return x


if __name__ == "__main__":
    output_size = 10
    params = init_params(output_size=output_size)

    key = jax.random.PRNGKey(0)
    # input_size=(28, 28), 1 channel is required by the 320-feature flatten.
    x = jax.random.normal(key, (2, 1, 28, 28), jnp.float32)

    ref = _reference_forward(params, x)
    scale = float(jnp.max(jnp.abs(ref)))

    fwd = jax.jit(cnn_forward, static_argnames=("output_size",))

    # f32 parity path (exact-layout check against the PyTorch-equivalent ref).
    prep32 = prepare_params(params, mxu_dtype=jnp.float32)
    out32 = jax.block_until_ready(fwd(prep32, x, output_size=output_size))
    assert out32.shape == (2, output_size), out32.shape
    assert out32.dtype == jnp.float32
    err32 = float(jnp.max(jnp.abs(out32 - ref)))
    assert err32 <= 0.05 * scale + 1e-3, (err32, scale)

    # bf16 MXU path (default / recommended on v5e, v6e, v7x).
    prep16 = prepare_params(params)  # mxu_dtype=jnp.bfloat16
    out16 = jax.block_until_ready(fwd(prep16, x, output_size=output_size))
    assert out16.shape == (2, output_size), out16.shape
    err16 = float(jnp.max(jnp.abs(out16 - ref)))
    assert err16 <= 0.10 * scale + 2e-2, (err16, scale)

    print("KERNEL_OK")
</pallas_src>

<mosaic_0001>
module attributes {stable_mosaic.version = 11 : i64} {
  func.func @_cnn_kernel(%arg0: i32, %arg1: memref<1x28x28xf32, #tpu.memory_space<vmem>>, %arg2: memref<5x28x240xf32, #tpu.memory_space<vmem>>, %arg3: memref<1x120xf32, #tpu.memory_space<vmem>>, %arg4: memref<5x120x160xf32, #tpu.memory_space<vmem>>, %arg5: memref<1x80xf32, #tpu.memory_space<vmem>>, %arg6: memref<320x64xf32, #tpu.memory_space<vmem>>, %arg7: memref<1x64xf32, #tpu.memory_space<vmem>>, %arg8: memref<64x128xf32, #tpu.memory_space<vmem>>, %arg9: memref<1x128xf32, #tpu.memory_space<vmem>>, %arg10: memref<1x1x128xf32, #tpu.memory_space<vmem>>) attributes {dimension_semantics = [#tpu.dimension_semantics<parallel>], iteration_bounds = array<i64: 2>, scalar_prefetch = 0 : i64, scratch_operands = 0 : i64, tpu.core_type = #tpu.core_type<tc>, window_params = [{transform_indices = @transform_0, window_bounds = array<i64: 1, 28, 28>}, {pipeline_mode = #tpu.pipeline_mode<synchronous>, transform_indices = @transform_1, window_bounds = array<i64: 5, 28, 240>}, {pipeline_mode = #tpu.pipeline_mode<synchronous>, transform_indices = @transform_2, window_bounds = array<i64: 1, 120>}, {pipeline_mode = #tpu.pipeline_mode<synchronous>, transform_indices = @transform_3, window_bounds = array<i64: 5, 120, 160>}, {pipeline_mode = #tpu.pipeline_mode<synchronous>, transform_indices = @transform_4, window_bounds = array<i64: 1, 80>}, {pipeline_mode = #tpu.pipeline_mode<synchronous>, transform_indices = @transform_5, window_bounds = array<i64: 320, 64>}, {pipeline_mode = #tpu.pipeline_mode<synchronous>, transform_indices = @transform_6, window_bounds = array<i64: 1, 64>}, {pipeline_mode = #tpu.pipeline_mode<synchronous>, transform_indices = @transform_7, window_bounds = array<i64: 64, 128>}, {pipeline_mode = #tpu.pipeline_mode<synchronous>, transform_indices = @transform_8, window_bounds = array<i64: 1, 128>}, {transform_indices = @transform_9, window_bounds = array<i64: 1, 1, 128>}]} {
    %c0 = arith.constant 0 : index
    %c0_0 = arith.constant 0 : index
    %c0_1 = arith.constant 0 : index
    %0 = vector.load %arg1[%c0, %c0_0, %c0_1] : memref<1x28x28xf32, #tpu.memory_space<vmem>>, vector<1x24x28xf32>
    %1 = vector.shape_cast %0 : vector<1x24x28xf32> to vector<24x28xf32>
    %c0_2 = arith.constant 0 : index
    %c0_3 = arith.constant 0 : index
    %c0_4 = arith.constant 0 : index
    %2 = vector.load %arg2[%c0_2, %c0_3, %c0_4] : memref<5x28x240xf32, #tpu.memory_space<vmem>>, vector<1x28x240xf32>
    %3 = vector.shape_cast %2 : vector<1x28x240xf32> to vector<28x240xf32>
    %cst = arith.constant dense<0.000000e+00> : vector<24x240xf32>
    %4 = tpu.matmul %1, %3, %cst {dimension_numbers = #tpu.dot_dimension_numbers<[1], [0], [0], [1], [0, 0, 1, 1], [], []>} : vector<24x28xf32>, vector<28x240xf32>, vector<24x240xf32> -> vector<24x240xf32>
    %c0_5 = arith.constant 0 : index
    %c1 = arith.constant 1 : index
    %c0_6 = arith.constant 0 : index
    %5 = vector.load %arg1[%c0_5, %c1, %c0_6] : memref<1x28x28xf32, #tpu.memory_space<vmem>>, vector<1x24x28xf32>
    %6 = vector.shape_cast %5 : vector<1x24x28xf32> to vector<24x28xf32>
    %c1_7 = arith.constant 1 : index
    %c0_8 = arith.constant 0 : index
    %c0_9 = arith.constant 0 : index
    %7 = vector.load %arg2[%c1_7, %c0_8, %c0_9] : memref<5x28x240xf32, #tpu.memory_space<vmem>>, vector<1x28x240xf32>
    %8 = vector.shape_cast %7 : vector<1x28x240xf32> to vector<28x240xf32>
    %cst_10 = arith.constant dense<0.000000e+00> : vector<24x240xf32>
    %9 = tpu.matmul %6, %8, %cst_10 {dimension_numbers = #tpu.dot_dimension_numbers<[1], [0], [0], [1], [0, 0, 1, 1], [], []>} : vector<24x28xf32>, vector<28x240xf32>, vector<24x240xf32> -> vector<24x240xf32>
    %10 = arith.addf %4, %9 : vector<24x240xf32>
    %c0_11 = arith.constant 0 : index
    %c2 = arith.constant 2 : index
    %c0_12 = arith.constant 0 : index
    %11 = vector.load %arg1[%c0_11, %c2, %c0_12] : memref<1x28x28xf32, #tpu.memory_space<vmem>>, vector<1x24x28xf32>
    %12 = vector.shape_cast %11 : vector<1x24x28xf32> to vector<24x28xf32>
    %c2_13 = arith.constant 2 : index
    %c0_14 = arith.constant 0 : index
    %c0_15 = arith.constant 0 : index
    %13 = vector.load %arg2[%c2_13, %c0_14, %c0_15] : memref<5x28x240xf32, #tpu.memory_space<vmem>>, vector<1x28x240xf32>
    %14 = vector.shape_cast %13 : vector<1x28x240xf32> to vector<28x240xf32>
    %cst_16 = arith.constant dense<0.000000e+00> : vector<24x240xf32>
    %15 = tpu.matmul %12, %14, %cst_16 {dimension_numbers = #tpu.dot_dimension_numbers<[1], [0], [0], [1], [0, 0, 1, 1], [], []>} : vector<24x28xf32>, vector<28x240xf32>, vector<24x240xf32> -> vector<24x240xf32>
    %16 = arith.addf %10, %15 : vector<24x240xf32>
    %c0_17 = arith.constant 0 : index
    %c3 = arith.constant 3 : index
    %c0_18 = arith.constant 0 : index
    %17 = vector.load %arg1[%c0_17, %c3, %c0_18] : memref<1x28x28xf32, #tpu.memory_space<vmem>>, vector<1x24x28xf32>
    %18 = vector.shape_cast %17 : vector<1x24x28xf32> to vector<24x28xf32>
    %c3_19 = arith.constant 3 : index
    %c0_20 = arith.constant 0 : index
    %c0_21 = arith.constant 0 : index
    %19 = vector.load %arg2[%c3_19, %c0_20, %c0_21] : memref<5x28x240xf32, #tpu.memory_space<vmem>>, vector<1x28x240xf32>
    %20 = vector.shape_cast %19 : vector<1x28x240xf32> to vector<28x240xf32>
    %cst_22 = arith.constant dense<0.000000e+00> : vector<24x240xf32>
    %21 = tpu.matmul %18, %20, %cst_22 {dimension_numbers = #tpu.dot_dimension_numbers<[1], [0], [0], [1], [0, 0, 1, 1], [], []>} : vector<24x28xf32>, vector<28x240xf32>, vector<24x240xf32> -> vector<24x240xf32>
    %22 = arith.addf %16, %21 : vector<24x240xf32>
    %c0_23 = arith.constant 0 : index
    %c4 = arith.constant 4 : index
    %c0_24 = arith.constant 0 : index
    %23 = vector.load %arg1[%c0_23, %c4, %c0_24] : memref<1x28x28xf32, #tpu.memory_space<vmem>>, vector<1x24x28xf32>
    %24 = vector.shape_cast %23 : vector<1x24x28xf32> to vector<24x28xf32>
    %c4_25 = arith.constant 4 : index
    %c0_26 = arith.constant 0 : index
    %c0_27 = arith.constant 0 : index
    %25 = vector.load %arg2[%c4_25, %c0_26, %c0_27] : memref<5x28x240xf32, #tpu.memory_space<vmem>>, vector<1x28x240xf32>
    %26 = vector.shape_cast %25 : vector<1x28x240xf32> to vector<28x240xf32>
    %cst_28 = arith.constant dense<0.000000e+00> : vector<24x240xf32>
    %27 = tpu.matmul %24, %26, %cst_28 {dimension_numbers = #tpu.dot_dimension_numbers<[1], [0], [0], [1], [0, 0, 1, 1], [], []>} : vector<24x28xf32>, vector<28x240xf32>, vector<24x240xf32> -> vector<24x240xf32>
    %28 = arith.addf %22, %27 : vector<24x240xf32>
    %29 = vector.extract_strided_slice %28 {offsets = [0, 0], sizes = [24, 10], strides = [1, 1]} : vector<24x240xf32> to vector<24x10xf32>
    %30 = vector.extract_strided_slice %28 {offsets = [0, 10], sizes = [24, 10], strides = [1, 1]} : vector<24x240xf32> to vector<24x10xf32>
    %31 = arith.maximumf %29, %30 : vector<24x10xf32>
    %32 = vector.extract_strided_slice %28 {offsets = [0, 20], sizes = [24, 10], strides = [1, 1]} : vector<24x240xf32> to vector<24x10xf32>
    %33 = vector.extract_strided_slice %28 {offsets = [0, 30], sizes = [24, 10], strides = [1, 1]} : vector<24x240xf32> to vector<24x10xf32>
    %34 = arith.maximumf %32, %33 : vector<24x10xf32>
    %35 = vector.extract_strided_slice %28 {offsets = [0, 40], sizes = [24, 10], strides = [1, 1]} : vector<24x240xf32> to vector<24x10xf32>
    %36 = vector.extract_strided_slice %28 {offsets = [0, 50], sizes = [24, 10], strides = [1, 1]} : vector<24x240xf32> to vector<24x10xf32>
    %37 = arith.maximumf %35, %36 : vector<24x10xf32>
    %38 = vector.extract_strided_slice %28 {offsets = [0, 60], sizes = [24, 10], strides = [1, 1]} : vector<24x240xf32> to vector<24x10xf32>
    %39 = vector.extract_strided_slice %28 {offsets = [0, 70], sizes = [24, 10], strides = [1, 1]} : vector<24x240xf32> to vector<24x10xf32>
    %40 = arith.maximumf %38, %39 : vector<24x10xf32>
    %41 = vector.extract_strided_slice %28 {offsets = [0, 80], sizes = [24, 10], strides = [1, 1]} : vector<24x240xf32> to vector<24x10xf32>
    %42 = vector.extract_strided_slice %28 {offsets = [0, 90], sizes = [24, 10], strides = [1, 1]} : vector<24x240xf32> to vector<24x10xf32>
    %43 = arith.maximumf %41, %42 : vector<24x10xf32>
    %44 = vector.extract_strided_slice %28 {offsets = [0, 100], sizes = [24, 10], strides = [1, 1]} : vector<24x240xf32> to vector<24x10xf32>
    %45 = vector.extract_strided_slice %28 {offsets = [0, 110], sizes = [24, 10], strides = [1, 1]} : vector<24x240xf32> to vector<24x10xf32>
    %46 = arith.maximumf %44, %45 : vector<24x10xf32>
    %47 = vector.extract_strided_slice %28 {offsets = [0, 120], sizes = [24, 10], strides = [1, 1]} : vector<24x240xf32> to vector<24x10xf32>
    %48 = vector.extract_strided_slice %28 {offsets = [0, 130], sizes = [24, 10], strides = [1, 1]} : vector<24x240xf32> to vector<24x10xf32>
    %49 = arith.maximumf %47, %48 : vector<24x10xf32>
    %50 = vector.extract_strided_slice %28 {offsets = [0, 140], sizes = [24, 10], strides = [1, 1]} : vector<24x240xf32> to vector<24x10xf32>
    %51 = vector.extract_strided_slice %28 {offsets = [0, 150], sizes = [24, 10], strides = [1, 1]} : vector<24x240xf32> to vector<24x10xf32>
    %52 = arith.maximumf %50, %51 : vector<24x10xf32>
    %53 = vector.extract_strided_slice %28 {offsets = [0, 160], sizes = [24, 10], strides = [1, 1]} : vector<24x240xf32> to vector<24x10xf32>
    %54 = vector.extract_strided_slice %28 {offsets = [0, 170], sizes = [24, 10], strides = [1, 1]} : vector<24x240xf32> to vector<24x10xf32>
    %55 = arith.maximumf %53, %54 : vector<24x10xf32>
    %56 = vector.extract_strided_slice %28 {offsets = [0, 180], sizes = [24, 10], strides = [1, 1]} : vector<24x240xf32> to vector<24x10xf32>
    %57 = vector.extract_strided_slice %28 {offsets = [0, 190], sizes = [24, 10], strides = [1, 1]} : vector<24x240xf32> to vector<24x10xf32>
    %58 = arith.maximumf %56, %57 : vector<24x10xf32>
    %59 = vector.extract_strided_slice %28 {offsets = [0, 200], sizes = [24, 10], strides = [1, 1]} : vector<24x240xf32> to vector<24x10xf32>
    %60 = vector.extract_strided_slice %28 {offsets = [0, 210], sizes = [24, 10], strides = [1, 1]} : vector<24x240xf32> to vector<24x10xf32>
    %61 = arith.maximumf %59, %60 : vector<24x10xf32>
    %62 = vector.extract_strided_slice %28 {offsets = [0, 220], sizes = [24, 10], strides = [1, 1]} : vector<24x240xf32> to vector<24x10xf32>
    %63 = vector.extract_strided_slice %28 {offsets = [0, 230], sizes = [24, 10], strides = [1, 1]} : vector<24x240xf32> to vector<24x10xf32>
    %64 = arith.maximumf %62, %63 : vector<24x10xf32>
    %65 = tpu.concatenate %31, %34, %37, %40, %43, %46, %49, %52, %55, %58, %61, %64 in 1 : vector<24x10xf32>, vector<24x10xf32>, vector<24x10xf32>, vector<24x10xf32>, vector<24x10xf32>, vector<24x10xf32>, vector<24x10xf32>, vector<24x10xf32>, vector<24x10xf32>, vector<24x10xf32>, vector<24x10xf32>, vector<24x10xf32> -> vector<24x120xf32>
    %66 = vector.extract_strided_slice %65 {offsets = [0, 0], sizes = [1, 120], strides = [1, 1]} : vector<24x120xf32> to vector<1x120xf32>
    %67 = vector.extract_strided_slice %65 {offsets = [1, 0], sizes = [1, 120], strides = [1, 1]} : vector<24x120xf32> to vector<1x120xf32>
    %68 = arith.maximumf %66, %67 : vector<1x120xf32>
    %69 = vector.extract_strided_slice %65 {offsets = [2, 0], sizes = [1, 120], strides = [1, 1]} : vector<24x120xf32> to vector<1x120xf32>
    %70 = vector.extract_strided_slice %65 {offsets = [3, 0], sizes = [1, 120], strides = [1, 1]} : vector<24x120xf32> to vector<1x120xf32>
    %71 = arith.maximumf %69, %70 : vector<1x120xf32>
    %72 = vector.extract_strided_slice %65 {offsets = [4, 0], sizes = [1, 120], strides = [1, 1]} : vector<24x120xf32> to vector<1x120xf32>
    %73 = vector.extract_strided_slice %65 {offsets = [5, 0], sizes = [1, 120], strides = [1, 1]} : vector<24x120xf32> to vector<1x120xf32>
    %74 = arith.maximumf %72, %73 : vector<1x120xf32>
    %75 = vector.extract_strided_slice %65 {offsets = [6, 0], sizes = [1, 120], strides = [1, 1]} : vector<24x120xf32> to vector<1x120xf32>
    %76 = vector.extract_strided_slice %65 {offsets = [7, 0], sizes = [1, 120], strides = [1, 1]} : vector<24x120xf32> to vector<1x120xf32>
    %77 = arith.maximumf %75, %76 : vector<1x120xf32>
    %78 = vector.extract_strided_slice %65 {offsets = [8, 0], sizes = [1, 120], strides = [1, 1]} : vector<24x120xf32> to vector<1x120xf32>
    %79 = vector.extract_strided_slice %65 {offsets = [9, 0], sizes = [1, 120], strides = [1, 1]} : vector<24x120xf32> to vector<1x120xf32>
    %80 = arith.maximumf %78, %79 : vector<1x120xf32>
    %81 = vector.extract_strided_slice %65 {offsets = [10, 0], sizes = [1, 120], strides = [1, 1]} : vector<24x120xf32> to vector<1x120xf32>
    %82 = vector.extract_strided_slice %65 {offsets = [11, 0], sizes = [1, 120], strides = [1, 1]} : vector<24x120xf32> to vector<1x120xf32>
    %83 = arith.maximumf %81, %82 : vector<1x120xf32>
    %84 = vector.extract_strided_slice %65 {offsets = [12, 0], sizes = [1, 120], strides = [1, 1]} : vector<24x120xf32> to vector<1x120xf32>
    %85 = vector.extract_strided_slice %65 {offsets = [13, 0], sizes = [1, 120], strides = [1, 1]} : vector<24x120xf32> to vector<1x120xf32>
    %86 = arith.maximumf %84, %85 : vector<1x120xf32>
    %87 = vector.extract_strided_slice %65 {offsets = [14, 0], sizes = [1, 120], strides = [1, 1]} : vector<24x120xf32> to vector<1x120xf32>
    %88 = vector.extract_strided_slice %65 {offsets = [15, 0], sizes = [1, 120], strides = [1, 1]} : vector<24x120xf32> to vector<1x120xf32>
    %89 = arith.maximumf %87, %88 : vector<1x120xf32>
    %90 = vector.extract_strided_slice %65 {offsets = [16, 0], sizes = [1, 120], strides = [1, 1]} : vector<24x120xf32> to vector<1x120xf32>
    %91 = vector.extract_strided_slice %65 {offsets = [17, 0], sizes = [1, 120], strides = [1, 1]} : vector<24x120xf32> to vector<1x120xf32>
    %92 = arith.maximumf %90, %91 : vector<1x120xf32>
    %93 = vector.extract_strided_slice %65 {offsets = [18, 0], sizes = [1, 120], strides = [1, 1]} : vector<24x120xf32> to vector<1x120xf32>
    %94 = vector.extract_strided_slice %65 {offsets = [19, 0], sizes = [1, 120], strides = [1, 1]} : vector<24x120xf32> to vector<1x120xf32>
    %95 = arith.maximumf %93, %94 : vector<1x120xf32>
    %96 = vector.extract_strided_slice %65 {offsets = [20, 0], sizes = [1, 120], strides = [1, 1]} : vector<24x120xf32> to vector<1x120xf32>
    %97 = vector.extract_strided_slice %65 {offsets = [21, 0], sizes = [1, 120], strides = [1, 1]} : vector<24x120xf32> to vector<1x120xf32>
    %98 = arith.maximumf %96, %97 : vector<1x120xf32>
    %99 = vector.extract_strided_slice %65 {offsets = [22, 0], sizes = [1, 120], strides = [1, 1]} : vector<24x120xf32> to vector<1x120xf32>
    %100 = vector.extract_strided_slice %65 {offsets = [23, 0], sizes = [1, 120], strides = [1, 1]} : vector<24x120xf32> to vector<1x120xf32>
    %101 = arith.maximumf %99, %100 : vector<1x120xf32>
    %102 = tpu.concatenate %68, %71, %74, %77, %80, %83, %86, %89, %92, %95, %98, %101 in 0 : vector<1x120xf32>, vector<1x120xf32>, vector<1x120xf32>, vector<1x120xf32>, vector<1x120xf32>, vector<1x120xf32>, vector<1x120xf32>, vector<1x120xf32>, vector<1x120xf32>, vector<1x120xf32>, vector<1x120xf32>, vector<1x120xf32> -> vector<12x120xf32>
    %c0_29 = arith.constant 0 : index
    %c0_30 = arith.constant 0 : index
    %103 = vector.load %arg3[%c0_29, %c0_30] : memref<1x120xf32, #tpu.memory_space<vmem>>, vector<1x120xf32>
    %104 = vector.broadcast %103 : vector<1x120xf32> to vector<12x120xf32>
    %105 = arith.addf %102, %104 : vector<12x120xf32>
    %106 = vector.extract_strided_slice %105 {offsets = [0, 0], sizes = [8, 120], strides = [1, 1]} : vector<12x120xf32> to vector<8x120xf32>
    %c0_31 = arith.constant 0 : index
    %c0_32 = arith.constant 0 : index
    %c0_33 = arith.constant 0 : index
    %107 = vector.load %arg4[%c0_31, %c0_32, %c0_33] : memref<5x120x160xf32, #tpu.memory_space<vmem>>, vector<1x120x160xf32>
    %108 = vector.shape_cast %107 : vector<1x120x160xf32> to vector<120x160xf32>
    %cst_34 = arith.constant dense<0.000000e+00> : vector<8x160xf32>
    %109 = tpu.matmul %106, %108, %cst_34 {dimension_numbers = #tpu.dot_dimension_numbers<[1], [0], [0], [1], [0, 0, 1, 1], [], []>} : vector<8x120xf32>, vector<120x160xf32>, vector<8x160xf32> -> vector<8x160xf32>
    %110 = vector.extract_strided_slice %105 {offsets = [1, 0], sizes = [8, 120], strides = [1, 1]} : vector<12x120xf32> to vector<8x120xf32>
    %c1_35 = arith.constant 1 : index
    %c0_36 = arith.constant 0 : index
    %c0_37 = arith.constant 0 : index
    %111 = vector.load %arg4[%c1_35, %c0_36, %c0_37] : memref<5x120x160xf32, #tpu.memory_space<vmem>>, vector<1x120x160xf32>
    %112 = vector.shape_cast %111 : vector<1x120x160xf32> to vector<120x160xf32>
    %cst_38 = arith.constant dense<0.000000e+00> : vector<8x160xf32>
    %113 = tpu.matmul %110, %112, %cst_38 {dimension_numbers = #tpu.dot_dimension_numbers<[1], [0], [0], [1], [0, 0, 1, 1], [], []>} : vector<8x120xf32>, vector<120x160xf32>, vector<8x160xf32> -> vector<8x160xf32>
    %114 = arith.addf %109, %113 : vector<8x160xf32>
    %115 = vector.extract_strided_slice %105 {offsets = [2, 0], sizes = [8, 120], strides = [1, 1]} : vector<12x120xf32> to vector<8x120xf32>
    %c2_39 = arith.constant 2 : index
    %c0_40 = arith.constant 0 : index
    %c0_41 = arith.constant 0 : index
    %116 = vector.load %arg4[%c2_39, %c0_40, %c0_41] : memref<5x120x160xf32, #tpu.memory_space<vmem>>, vector<1x120x160xf32>
    %117 = vector.shape_cast %116 : vector<1x120x160xf32> to vector<120x160xf32>
    %cst_42 = arith.constant dense<0.000000e+00> : vector<8x160xf32>
    %118 = tpu.matmul %115, %117, %cst_42 {dimension_numbers = #tpu.dot_dimension_numbers<[1], [0], [0], [1], [0, 0, 1, 1], [], []>} : vector<8x120xf32>, vector<120x160xf32>, vector<8x160xf32> -> vector<8x160xf32>
    %119 = arith.addf %114, %118 : vector<8x160xf32>
    %120 = vector.extract_strided_slice %105 {offsets = [3, 0], sizes = [8, 120], strides = [1, 1]} : vector<12x120xf32> to vector<8x120xf32>
    %c3_43 = arith.constant 3 : index
    %c0_44 = arith.constant 0 : index
    %c0_45 = arith.constant 0 : index
    %121 = vector.load %arg4[%c3_43, %c0_44, %c0_45] : memref<5x120x160xf32, #tpu.memory_space<vmem>>, vector<1x120x160xf32>
    %122 = vector.shape_cast %121 : vector<1x120x160xf32> to vector<120x160xf32>
    %cst_46 = arith.constant dense<0.000000e+00> : vector<8x160xf32>
    %123 = tpu.matmul %120, %122, %cst_46 {dimension_numbers = #tpu.dot_dimension_numbers<[1], [0], [0], [1], [0, 0, 1, 1], [], []>} : vector<8x120xf32>, vector<120x160xf32>, vector<8x160xf32> -> vector<8x160xf32>
    %124 = arith.addf %119, %123 : vector<8x160xf32>
    %125 = vector.extract_strided_slice %105 {offsets = [4, 0], sizes = [8, 120], strides = [1, 1]} : vector<12x120xf32> to vector<8x120xf32>
    %c4_47 = arith.constant 4 : index
    %c0_48 = arith.constant 0 : index
    %c0_49 = arith.constant 0 : index
    %126 = vector.load %arg4[%c4_47, %c0_48, %c0_49] : memref<5x120x160xf32, #tpu.memory_space<vmem>>, vector<1x120x160xf32>
    %127 = vector.shape_cast %126 : vector<1x120x160xf32> to vector<120x160xf32>
    %cst_50 = arith.constant dense<0.000000e+00> : vector<8x160xf32>
    %128 = tpu.matmul %125, %127, %cst_50 {dimension_numbers = #tpu.dot_dimension_numbers<[1], [0], [0], [1], [0, 0, 1, 1], [], []>} : vector<8x120xf32>, vector<120x160xf32>, vector<8x160xf32> -> vector<8x160xf32>
    %129 = arith.addf %124, %128 : vector<8x160xf32>
    %130 = vector.extract_strided_slice %129 {offsets = [0, 0], sizes = [8, 20], strides = [1, 1]} : vector<8x160xf32> to vector<8x20xf32>
    %131 = vector.extract_strided_slice %129 {offsets = [0, 20], sizes = [8, 20], strides = [1, 1]} : vector<8x160xf32> to vector<8x20xf32>
    %132 = arith.maximumf %130, %131 : vector<8x20xf32>
    %133 = vector.extract_strided_slice %129 {offsets = [0, 40], sizes = [8, 20], strides = [1, 1]} : vector<8x160xf32> to vector<8x20xf32>
    %134 = vector.extract_strided_slice %129 {offsets = [0, 60], sizes = [8, 20], strides = [1, 1]} : vector<8x160xf32> to vector<8x20xf32>
    %135 = arith.maximumf %133, %134 : vector<8x20xf32>
    %136 = vector.extract_strided_slice %129 {offsets = [0, 80], sizes = [8, 20], strides = [1, 1]} : vector<8x160xf32> to vector<8x20xf32>
    %137 = vector.extract_strided_slice %129 {offsets = [0, 100], sizes = [8, 20], strides = [1, 1]} : vector<8x160xf32> to vector<8x20xf32>
    %138 = arith.maximumf %136, %137 : vector<8x20xf32>
    %139 = vector.extract_strided_slice %129 {offsets = [0, 120], sizes = [8, 20], strides = [1, 1]} : vector<8x160xf32> to vector<8x20xf32>
    %140 = vector.extract_strided_slice %129 {offsets = [0, 140], sizes = [8, 20], strides = [1, 1]} : vector<8x160xf32> to vector<8x20xf32>
    %141 = arith.maximumf %139, %140 : vector<8x20xf32>
    %142 = tpu.concatenate %132, %135, %138, %141 in 1 : vector<8x20xf32>, vector<8x20xf32>, vector<8x20xf32>, vector<8x20xf32> -> vector<8x80xf32>
    %143 = vector.extract_strided_slice %142 {offsets = [0, 0], sizes = [1, 80], strides = [1, 1]} : vector<8x80xf32> to vector<1x80xf32>
    %144 = vector.extract_strided_slice %142 {offsets = [1, 0], sizes = [1, 80], strides = [1, 1]} : vector<8x80xf32> to vector<1x80xf32>
    %145 = arith.maximumf %143, %144 : vector<1x80xf32>
    %146 = vector.extract_strided_slice %142 {offsets = [2, 0], sizes = [1, 80], strides = [1, 1]} : vector<8x80xf32> to vector<1x80xf32>
    %147 = vector.extract_strided_slice %142 {offsets = [3, 0], sizes = [1, 80], strides = [1, 1]} : vector<8x80xf32> to vector<1x80xf32>
    %148 = arith.maximumf %146, %147 : vector<1x80xf32>
    %149 = vector.extract_strided_slice %142 {offsets = [4, 0], sizes = [1, 80], strides = [1, 1]} : vector<8x80xf32> to vector<1x80xf32>
    %150 = vector.extract_strided_slice %142 {offsets = [5, 0], sizes = [1, 80], strides = [1, 1]} : vector<8x80xf32> to vector<1x80xf32>
    %151 = arith.maximumf %149, %150 : vector<1x80xf32>
    %152 = vector.extract_strided_slice %142 {offsets = [6, 0], sizes = [1, 80], strides = [1, 1]} : vector<8x80xf32> to vector<1x80xf32>
    %153 = vector.extract_strided_slice %142 {offsets = [7, 0], sizes = [1, 80], strides = [1, 1]} : vector<8x80xf32> to vector<1x80xf32>
    %154 = arith.maximumf %152, %153 : vector<1x80xf32>
    %155 = tpu.concatenate %145, %148, %151, %154 in 0 : vector<1x80xf32>, vector<1x80xf32>, vector<1x80xf32>, vector<1x80xf32> -> vector<4x80xf32>
    %c0_51 = arith.constant 0 : index
    %c0_52 = arith.constant 0 : index
    %156 = vector.load %arg5[%c0_51, %c0_52] : memref<1x80xf32, #tpu.memory_space<vmem>>, vector<1x80xf32>
    %157 = vector.broadcast %156 : vector<1x80xf32> to vector<4x80xf32>
    %158 = arith.addf %155, %157 : vector<4x80xf32>
    %159 = vector.extract_strided_slice %158 {offsets = [0, 0], sizes = [1, 80], strides = [1, 1]} : vector<4x80xf32> to vector<1x80xf32>
    %160 = vector.extract_strided_slice %158 {offsets = [1, 0], sizes = [1, 80], strides = [1, 1]} : vector<4x80xf32> to vector<1x80xf32>
    %161 = vector.extract_strided_slice %158 {offsets = [2, 0], sizes = [1, 80], strides = [1, 1]} : vector<4x80xf32> to vector<1x80xf32>
    %162 = vector.extract_strided_slice %158 {offsets = [3, 0], sizes = [1, 80], strides = [1, 1]} : vector<4x80xf32> to vector<1x80xf32>
    %163 = tpu.concatenate %159, %160, %161, %162 in 1 : vector<1x80xf32>, vector<1x80xf32>, vector<1x80xf32>, vector<1x80xf32> -> vector<1x320xf32>
    %c0_53 = arith.constant 0 : index
    %c0_54 = arith.constant 0 : index
    %164 = vector.load %arg6[%c0_53, %c0_54] : memref<320x64xf32, #tpu.memory_space<vmem>>, vector<320x64xf32>
    %cst_55 = arith.constant dense<0.000000e+00> : vector<1x64xf32>
    %165 = tpu.matmul %163, %164, %cst_55 {dimension_numbers = #tpu.dot_dimension_numbers<[1], [0], [0], [1], [0, 0, 1, 1], [], []>} : vector<1x320xf32>, vector<320x64xf32>, vector<1x64xf32> -> vector<1x64xf32>
    %c0_56 = arith.constant 0 : index
    %c0_57 = arith.constant 0 : index
    %166 = vector.load %arg7[%c0_56, %c0_57] : memref<1x64xf32, #tpu.memory_space<vmem>>, vector<1x64xf32>
    %167 = arith.addf %165, %166 : vector<1x64xf32>
    %c0_58 = arith.constant 0 : index
    %c0_59 = arith.constant 0 : index
    %168 = vector.load %arg8[%c0_58, %c0_59] : memref<64x128xf32, #tpu.memory_space<vmem>>, vector<64x128xf32>
    %cst_60 = arith.constant dense<0.000000e+00> : vector<1x128xf32>
    %169 = tpu.matmul %167, %168, %cst_60 {dimension_numbers = #tpu.dot_dimension_numbers<[1], [0], [0], [1], [0, 0, 1, 1], [], []>} : vector<1x64xf32>, vector<64x128xf32>, vector<1x128xf32> -> vector<1x128xf32>
    %c0_61 = arith.constant 0 : index
    %c0_62 = arith.constant 0 : index
    %170 = vector.load %arg9[%c0_61, %c0_62] : memref<1x128xf32, #tpu.memory_space<vmem>>, vector<1x128xf32>
    %171 = arith.addf %169, %170 : vector<1x128xf32>
    %172 = vector.shape_cast %171 : vector<1x128xf32> to vector<1x1x128xf32>
    %c0_63 = arith.constant 0 : index
    %c0_64 = arith.constant 0 : index
    %c0_65 = arith.constant 0 : index
    %173 = vector.load %arg10[%c0_63, %c0_64, %c0_65] : memref<1x1x128xf32, #tpu.memory_space<vmem>>, vector<1x1x128xf32>
    tpu.vector_store %arg10[%c0_63, %c0_64, %c0_65], %172 {strides = array<i32>} : memref<1x1x128xf32, #tpu.memory_space<vmem>>, vector<1x1x128xf32>,
    return
  }
  func.func @transform_0(%arg0: i32) -> (i32, i32, i32) {
    %c0_i32 = arith.constant 0 : i32
    %c0_i32_0 = arith.constant 0 : i32
    %c0_i32_1 = arith.constant 0 : i32
    return %arg0, %c0_i32, %c0_i32_0 : i32, i32, i32
  }
  func.func @transform_1(%arg0: i32) -> (i32, i32, i32) {
    %c0_i32 = arith.constant 0 : i32
    %c0_i32_0 = arith.constant 0 : i32
    %c0_i32_1 = arith.constant 0 : i32
    %c0_i32_2 = arith.constant 0 : i32
    return %c0_i32, %c0_i32_0, %c0_i32_1 : i32, i32, i32
  }
  func.func @transform_2(%arg0: i32) -> (i32, i32) {
    %c0_i32 = arith.constant 0 : i32
    %c0_i32_0 = arith.constant 0 : i32
    %c0_i32_1 = arith.constant 0 : i32
    return %c0_i32, %c0_i32_0 : i32, i32
  }
  func.func @transform_3(%arg0: i32) -> (i32, i32, i32) {
    %c0_i32 = arith.constant 0 : i32
    %c0_i32_0 = arith.constant 0 : i32
    %c0_i32_1 = arith.constant 0 : i32
    %c0_i32_2 = arith.constant 0 : i32
    return %c0_i32, %c0_i32_0, %c0_i32_1 : i32, i32, i32
  }
  func.func @transform_4(%arg0: i32) -> (i32, i32) {
    %c0_i32 = arith.constant 0 : i32
    %c0_i32_0 = arith.constant 0 : i32
    %c0_i32_1 = arith.constant 0 : i32
    return %c0_i32, %c0_i32_0 : i32, i32
  }
  func.func @transform_5(%arg0: i32) -> (i32, i32) {
    %c0_i32 = arith.constant 0 : i32
    %c0_i32_0 = arith.constant 0 : i32
    %c0_i32_1 = arith.constant 0 : i32
    return %c0_i32, %c0_i32_0 : i32, i32
  }
  func.func @transform_6(%arg0: i32) -> (i32, i32) {
    %c0_i32 = arith.constant 0 : i32
    %c0_i32_0 = arith.constant 0 : i32
    %c0_i32_1 = arith.constant 0 : i32
    return %c0_i32, %c0_i32_0 : i32, i32
  }
  func.func @transform_7(%arg0: i32) -> (i32, i32) {
    %c0_i32 = arith.constant 0 : i32
    %c0_i32_0 = arith.constant 0 : i32
    %c0_i32_1 = arith.constant 0 : i32
    return %c0_i32, %c0_i32_0 : i32, i32
  }
  func.func @transform_8(%arg0: i32) -> (i32, i32) {
    %c0_i32 = arith.constant 0 : i32
    %c0_i32_0 = arith.constant 0 : i32
    %c0_i32_1 = arith.constant 0 : i32
    return %c0_i32, %c0_i32_0 : i32, i32
  }
  func.func @transform_9(%arg0: i32) -> (i32, i32, i32) {
    %c0_i32 = arith.constant 0 : i32
    %c0_i32_0 = arith.constant 0 : i32
    %c0_i32_1 = arith.constant 0 : i32
    return %arg0, %c0_i32, %c0_i32_0 : i32, i32, i32
  }
}

</mosaic_0001>

<bundles_post_ra>
// kernel: cnn_forward.1
= control target key start
LH: loop header
LB: loop body
LE: loop exit
PB: predicated region body
PF: predicated region fallthrough
CT: control target
= control target key end

     0   :  { %s3938_s0 = inlined_call_operand.vmem [shape: f32[2,28,28], index: 0, kind: input, shape index: {}]   ;;  %s3939_s1 = inlined_call_operand.vmem [shape: f32[5,28,240], index: 1, kind: input, shape index: {}]   ;;  %s3940_s2 = inlined_call_operand.vmem [shape: f32[1,120], index: 2, kind: input, shape index: {}]   ;;  %s3941_s3 = inlined_call_operand.vmem [shape: f32[5,120,160], index: 3, kind: input, shape index: {}]   ;;  %s3942_s4 = inlined_call_operand.vmem [shape: f32[1,80], index: 4, kind: input, shape index: {}]   ;;  %s3943_s5 = inlined_call_operand.vmem [shape: f32[320,64], index: 5, kind: input, shape index: {}]   ;;  %s3944_s6 = inlined_call_operand.vmem [shape: f32[1,64], index: 6, kind: input, shape index: {}]   ;;  %s3945_s7 = inlined_call_operand.vmem [shape: f32[64,128], index: 7, kind: input, shape index: {}]   ;;  %s3946_s8 = inlined_call_operand.vmem [shape: f32[1,128], index: 8, kind: input, shape index: {}]   ;;  %s3947_s9 = inlined_call_operand.hbm [shape: f32[2,1,128], index: 9, kind: output, shape index: {}]  }
   0x1   :  { %3964 = sst [smem:[#allocation5_spill]] %s3938_s0 }
   0x2   :  { %3965 = sst [smem:[#allocation6_spill]] %s3939_s1 }
   0x3   :  { %14 = vsyncpa [#allocation3], 0 }
   0x4   :  { %16 = vsyncpa [#allocation3 + $0x1], 0  ;;  %s2853_s30 = smov 0   ;;  %s2855_s10 = smov 0  }
   0x5   :  { %s2857_s11 = smov 0   ;;  %s2859_s12 = smov 0  }
   0x6 LB: > { %s2874_s13 = sadd.s32 4294967295, %s2782_s12   ;;  %s2098_s14 = sadd.s32 4294967294, %s2782_s12   ;;  %s2782_s12 = sphi %s2859_s12, %s3986_s12   ;;  %s2778_s11 = sphi %s2857_s11, %s3985_s11   ;;  %s2774_s10 = sphi %s2855_s10, %s3984_s10   ;;  %s2770_s30 = sphi %s2853_s30, %s3983_s30  }
   0x7   : > { %s2878_s15 = sadd.s32 1, %s2782_s12   ;;  %s223_s16 = sadd.s32 1, %s2778_s11 }
   0x8   : > { %s220_s17 = ssub.s32 %s2782_s12, %s2878_s15  ;;  %p233_p0 = scmp.ne.s32.totalorder %s2778_s11, %s2774_s10 }
   0x9   : > { %p221_p1 = scmp.eq.s32.totalorder %s220_s17, 0  ;;  %p234_p2 = scmp.eq.s32.totalorder %s2874_s13, 1 }
   0xa   : > { %p239_p3 = scmp.ne.s32.totalorder %s2774_s10, %s2770_s30  ;;  %p240_p4 = scmp.eq.s32.totalorder %s2098_s14, 1 }
   0xb   : > { %s2889_s18 = scalar_select %p221_p1, %s2778_s11, %s223_s16  }
   0xc   : > { %p2891_p5 = por %p234_p2, %p233_p0  ;;  %p2895_p6 = por %p240_p4, %p239_p3 }
   0xd   : > { %p2101_p7 = scmp.ge.s32.totalorder %s2782_s12, 1  ;;  %p290_p8 = scmp.lt.s32.totalorder %s2782_s12, 3 }
   0xf   : > { %p291_p9 = pnand %p2101_p7, %p290_p8 }
  0x10   : > { %s3968_s1 = sld [smem:[#allocation6_spill]] (!%p291_p9)  ;;  %vm363_vm0 = vcmask (!%p291_p9), 1043456   ;;  %v2784_v7 = vmov (!%p291_p9), 0.0   ;;  %p325_p10 = scmp.lt.s32.totalorder (!%p291_p9), %s2874_s13, 1  ;;  %vm2785_vm1 = vmmov (!%p291_p9), 1   ;;  %vm353_vm3 = vcmask (!%p291_p9), 228352  }
  0x11   : > { %294 = sbr.rel (%p291_p9) target bundleno = 1771 (0x6eb), region = 56  ;;  %434 = vmatprep.mubr.f32.mxu0 (!%p291_p9), %v2784_v7  ;;  %1287 = vmatprep.mubr.f32.mxu1 (!%p291_p9), %v2784_v7  ;;  %vm2923_vm2 = vmpackc.low (!%p291_p9), %vm363_vm0, %vm2785_vm1  ;;  %s3971_s0 = sld [smem:[#allocation5_spill]] (!%p291_p9)  ;;  %vm1050_vm4 = vcmask (!%p291_p9), 80896   ;;  %vm1054_vm5 = vcmask (!%p291_p9), 162816   ;;  %vm1058_vm6 = vcmask (!%p291_p9), 244736   ;;  %vm1062_vm7 = vcmask (!%p291_p9), 326656  }
  0x12   : > { %s3954_s28 = smov (!%p291_p9), 118   ;;  %s3950_s29 = smov (!%p291_p9), 78   ;;  %vm998_vm8 = vcmask (!%p291_p9), 556032   ;;  %vm1066_vm9 = vcmask (!%p291_p9), 408576   ;;  %vm1070_vm10 = vcmask (!%p291_p9), 490496   ;;  %vm1074_vm11 = vcmask (!%p291_p9), 572416  }
  0x13   : > { %s3962_s16 = smov (!%p291_p9), 68   ;;  %s3961_s17 = smov (!%p291_p9), 48   ;;  %vm1078_vm12 = vcmask (!%p291_p9), 654336   ;;  %vm1082_vm13 = vcmask (!%p291_p9), 736256   ;;  %vm1086_vm14 = vcmask (!%p291_p9), 818176   ;;  %vm1090_vm15 = vcmask (!%p291_p9), 900096  }
  0x14   : > { %s3959_s21 = smov (!%p291_p9), 58   ;;  %s3960_s22 = smov (!%p291_p9), 38   ;;  %vm1129_vm1 = vcmask (!%p291_p9), 1040384  }
  0x15   : > { %s3948_s23 = smov (!%p291_p9), 18   ;;  %s3957_s24 = smov (!%p291_p9), 28  }
  0x16   : > { %v2105_v0 = vld [vmem:[%s3968_s1 + $0x48] sm:$0xff] (!%p291_p9)  ;;  %v2107_v1 = vld [vmem:[%s3968_s1 + $0x58] sm:$0xff] (!%p291_p9)  ;;  %v2104_v2 = vld [vmem:[%s3968_s1 + $0x40] sm:$0xff] (!%p291_p9) }
  0x17   : > { %v2385_v3 = vpack.c.bf16 (!%p291_p9), %v2107_v1, %v2105_v0  ;;  %v2106_v4 = vld [vmem:[%s3968_s1 + $0x50] sm:$0xff] (!%p291_p9)  ;;  %v2109_v5 = vld [vmem:[%s3968_s1 + $0x68] sm:$0xff] (!%p291_p9)  ;;  %v2111_v6 = vld [vmem:[%s3968_s1 + $0x78] sm:$0xf] (!%p291_p9) }
  0x18   : > { %v2387_v8 = vpack.c.bf16 %v2106_v4, %v2104_v2  ;;  %v2389_v9 = vpack.c.bf16 %v2111_v6, %v2109_v5  ;;  %v2108_v11 = vld [vmem:[%s3968_s1 + $0x60] sm:$0xff]  ;;  %v2110_v12 = vld [vmem:[%s3968_s1 + $0x70] sm:$0xf]  ;;  %s326_s25 = scalar_select %p325_p10, %s2874_s13, 1  ;;  %v334_v13 = vld [vmem:[%s3968_s1 + $0x8] sm:$0xff] }
  0x19   : > { %2386 = vmatprep.subr.bf16.mxu0 %v2385_v3  ;;  %v336_v14 = vld [vmem:[%s3968_s1 + $0x18] sm:$0xff]  ;;  %v2392_v15 = vpack.c.bf16 %v2110_v12, %v2108_v11  ;;  %v333_v17 = vld [vmem:[%s3968_s1] sm:$0xff]  ;;  %v335_v18 = vld [vmem:[%s3968_s1 + $0x10] sm:$0xff] }
  0x1a   : > { %2388 = vmatpush1.bf16.msra.mxu0 %v2387_v8  ;;  %s2293_s14 = sshll.u32 %s326_s25, 5  ;;  %v2395_v16 = vpack.c.bf16 %v336_v14, %v334_v13  ;;  %v338_v19 = vld [vmem:[%s3968_s1 + $0x28] sm:$0xff]  ;;  %v340_v20 = vld [vmem:[%s3968_s1 + $0x38] sm:$0xf]  ;;  %v2397_v22 = vpack.c.bf16 %v335_v18, %v333_v17  ;;  %v337_v24 = vld [vmem:[%s3968_s1 + $0x20] sm:$0xff]  ;;  %s3951_s25 = smov 98  }
  0x1b   : > { %2391 = vmatprep.subr.msk.bf16.mxu0 %vm2923_vm2, %v2389_v9  ;;  %s2951_s26 = scalar_lea.vmem %s3971_s0, %s2293_s14  ;;  %v2399_v23 = vpack.c.bf16 %v340_v20, %v338_v19  ;;  %v339_v25 = vld [vmem:[%s3968_s1 + $0x30] sm:$0xf]  ;;  %v2123_v26 = vld [vmem:[%s3968_s1 + $0x88] sm:$0xff]  ;;  %v2125_v27 = vld [vmem:[%s3968_s1 + $0x98] sm:$0xff]  ;;  %s3955_s14 = smov 88  }
  0x1c   : > { %v341_v21 = vld [vmem:[%s2951_s26 + $0x1] sm:$0xff]  ;;  %v342_v28 = vld [vmem:[%s2951_s26 + $0x9] sm:$0xff]  ;;  %v2402_v29 = vpack.c.bf16 %v339_v25, %v337_v24  ;;  %v2405_v30 = vpack.c.bf16 %v2125_v27, %v2123_v26  ;;  %v343_v31 = vld [vmem:[%s2951_s26 + $0x11] sm:$0xff]  ;;  %s3978_s0 = smov 78  }
  0x1d   : > { %v2122_v32 = vld [vmem:[%s3968_s1 + $0x80] sm:$0xff]  ;;  %v2124_v33 = vld [vmem:[%s3968_s1 + $0x90] sm:$0xff]  ;;  %v2127_v34 = vld [vmem:[%s3968_s1 + $0xa8] sm:$0xff] }
  0x1e   : > { %2394 = vmatpush1.bf16.msk.msra.mxu0 %vm2923_vm2, %v2392_v15  ;;  %v2129_v35 = vld [vmem:[%s3968_s1 + $0xb8] sm:$0xf]  ;;  %v330_v36 = vld [vmem:[%s2951_s26] sm:$0xff]  ;;  %v2407_v37 = vpack.c.bf16 %v2124_v33, %v2122_v32  ;;  %v2128_v40 = vld [vmem:[%s3968_s1 + $0xb0] sm:$0xf] }
  0x1f   : > { %2396 = vmatprep.subr.bf16.mxu0 %v2395_v16  ;;  %v2409_v38 = vpack.c.bf16 %v2129_v35, %v2127_v34  ;;  %v2126_v39 = vld [vmem:[%s3968_s1 + $0xa0] sm:$0xff]  ;;  %v2136_v41 = vld [vmem:[%s3968_s1 + $0xc8] sm:$0xff]  ;;  %v2138_v42 = vld [vmem:[%s3968_s1 + $0xd8] sm:$0xff] }
  0x20   : > { %v331_v43 = vld [vmem:[%s2951_s26 + $0x8] sm:$0xff]  ;;  %v2412_v44 = vpack.c.bf16 %v2128_v40, %v2126_v39  ;;  %v2415_v45 = vpack.c.bf16 %v2138_v42, %v2136_v41  ;;  %v332_v46 = vld [vmem:[%s2951_s26 + $0x10] sm:$0xff]  ;;  %v2135_v47 = vld [vmem:[%s3968_s1 + $0xc0] sm:$0xff] }
  0x21   : > { %2114 = vmatmul.mubr.msk.f32.vlgmr.msra.gmra.mrb[0].mxu0 %vm353_vm3, %v341_v21  ;;  %v2137_v48 = vld [vmem:[%s3968_s1 + $0xd0] sm:$0xff]  ;;  %v2140_v49 = vld [vmem:[%s3968_s1 + $0xe8] sm:$0xff]  ;;  %v2142_v50 = vld [vmem:[%s3968_s1 + $0xf8] sm:$0xf] }
  0x22   : > { %2398 = vmatpush1.bf16.msra.mxu0 %v2397_v22  ;;  %440 = vmatprep.mubr.f32.mxu0 %v2784_v7  ;;  %v551_v51 = vld [vmem:[%s2951_s26 + $0x2] sm:$0xff]  ;;  %v2417_v52 = vpack.c.bf16 %v2137_v48, %v2135_v47  ;;  %v2419_v53 = vpack.c.bf16 %v2142_v50, %v2140_v49  ;;  %v2141_v55 = vld [vmem:[%s3968_s1 + $0xf0] sm:$0xf]  ;;  %v2151_v57 = vld [vmem:[%s3968_s1 + $0x118] sm:$0xff] }
  0x23   : > { %2401 = vmatprep.subr.msk.bf16.mxu0 %vm2923_vm2, %v2399_v23  ;;  %v2139_v54 = vld [vmem:[%s3968_s1 + $0xe0] sm:$0xff]  ;;  %v2149_v56 = vld [vmem:[%s3968_s1 + $0x108] sm:$0xff]  ;;  %v553_v61 = vld [vmem:[%s2951_s26 + $0x12] sm:$0xff] }
  0x24   : > { %v552_v58 = vld [vmem:[%s2951_s26 + $0xa] sm:$0xff]  ;;  %v2422_v59 = vpack.c.bf16 %v2141_v55, %v2139_v54  ;;  %v2425_v60 = vpack.c.bf16 %v2151_v57, %v2149_v56  ;;  %v2148_v62 = vld [vmem:[%s3968_s1 + $0x100] sm:$0xff]  ;;  %v2155_v1 = vld [vmem:[%s3968_s1 + $0x138] sm:$0xf] }
  0x25   : > { %2115 = vmatmul.mubr.msk.f32.gmra.mrb[2].mxu0 %vm353_vm3, %v342_v28  ;;  %v2150_v63 = vld [vmem:[%s3968_s1 + $0x110] sm:$0xff]  ;;  %v2153_v0 = vld [vmem:[%s3968_s1 + $0x128] sm:$0xff]  ;;  %v2152_v5 = vld [vmem:[%s3968_s1 + $0x120] sm:$0xff] }
  0x26   : > { %446 = vmatprep.mubr.f32.mxu0 %v2784_v7  ;;  %2404 = vmatpush1.bf16.msk.msra.mxu0 %vm2923_vm2, %v2402_v29  ;;  %v667_v2 = vld [vmem:[%s2951_s26 + $0x3] sm:$0xff]  ;;  %v2427_v3 = vpack.c.bf16 %v2150_v63, %v2148_v62  ;;  %v2429_v4 = vpack.c.bf16 %v2155_v1, %v2153_v0  ;;  %v2154_v6 = vld [vmem:[%s3968_s1 + $0x130] sm:$0xf]  ;;  %v785_v14 = vld [vmem:[%s2951_s26 + $0x14] sm:$0xff]  ;;  %s3979_s1 = smov 48  }
  0x27   : > { %2406 = vmatprep.subr.bf16.mxu0 %v2405_v30  ;;  %v668_v8 = vld [vmem:[%s2951_s26 + $0xb] sm:$0xff]  ;;  %v2432_v9 = vpack.c.bf16 %v2154_v6, %v2152_v5  ;;  %v669_v11 = vld [vmem:[%s2951_s26 + $0x13] sm:$0xff]  ;;  %v2164_v34 = vld [vmem:[%s3941_s3 + $0x100] sm:$0xff] }
  0x28   : > { %v783_v12 = vld [vmem:[%s2951_s26 + $0x4] sm:$0xff]  ;;  %v784_v13 = vld [vmem:[%s2951_s26 + $0xc] sm:$0xff]  ;;  %s3952_s26 = smov 108   ;;  %v2163_v30 = vld [vmem:[%s3941_s3 + $0xf8] sm:$0xff] }
  0x29   : > { %2116 = vmatmul.mubr.msk.f32.gmra.mrb[4].mxu0 %vm353_vm3, %v343_v31  ;;  %v2165_v31 = vld [vmem:[%s3941_s3 + $0x108] sm:$0xff]  ;;  %v2162_v33 = vld [vmem:[%s3941_s3 + $0xf0] sm:$0xff]  ;;  %v2168_v42 = vld [vmem:[%s3941_s3 + $0x120] sm:$0xff] }
  0x2a   : > { %532 = vmatprep.mubr.f32.mxu0 %v2784_v7  ;;  %v2435_v32 = vpack.c.bf16 %v2165_v31, %v2163_v30  ;;  %v2166_v41 = vld [vmem:[%s3941_s3 + $0x110] sm:$0xff]  ;;  %v2172_v48 = vld [vmem:[%s3941_s3 + $0x140] sm:$0xff]  ;;  %v2183_v1 = vld [vmem:[%s3941_s3 + $0x198] sm:$0xff] }
  0x2b   : > { %v2170_v47 = vld [vmem:[%s3941_s3 + $0x130] sm:$0xff]  ;;  %v2176_v56 = vld [vmem:[%s3941_s3 + $0x160] sm:$0xff] }
  0x2c   : > { %2436 = vmatprep.subr.bf16.mxu1 %v2435_v32  ;;  %v2445_v50 = vpack.c.bf16 %v2172_v48, %v2170_v47  ;;  %v2174_v55 = vld [vmem:[%s3941_s3 + $0x150] sm:$0xff]  ;;  %v2180_v63 = vld [vmem:[%s3941_s3 + $0x180] sm:$0xff] }
  0x2d   : > { %2119 = vmatmul.mubr.msk.f32.vlgmr.msra.gmra.mrb[0].mxu0 %vm353_vm3, %v330_v36  ;;  %v2437_v36 = vpack.c.bf16 %v2164_v34, %v2162_v33  ;;  %v2449_v57 = vpack.c.bf16 %v2176_v56, %v2174_v55  ;;  %v2178_v62 = vld [vmem:[%s3941_s3 + $0x170] sm:$0xff]  ;;  %v2184_v5 = vld [vmem:[%s3941_s3 + $0x1a0] sm:$0xff] }
  0x2e   : > { %2408 = vmatpush1.bf16.msra.mxu0 %v2407_v37  ;;  %538 = vmatprep.mubr.f32.mxu0 %v2784_v7  ;;  %v2167_v37 = vld [vmem:[%s3941_s3 + $0x118] sm:$0xff]  ;;  %v2453_v0 = vpack.c.bf16 %v2180_v63, %v2178_v62 }
  0x2f   : > { %2411 = vmatprep.subr.msk.bf16.mxu0 %vm2923_vm2, %v2409_v38  ;;  %v2169_v38 = vld [vmem:[%s3941_s3 + $0x128] sm:$0xff]  ;;  %2438 = vmatpush1.bf16.msra.mxu1 %v2437_v36 }
  0x30   : > { %v2439_v40 = vpack.c.bf16 %v2169_v38, %v2167_v37 }
  0x31   : > { %2120 = vmatmul.mubr.msk.f32.gmra.mrb[2].mxu0 %vm353_vm3, %v331_v43  ;;  %v2441_v43 = vpack.c.bf16 %v2168_v42, %v2166_v41 }
  0x32   : > { %544 = vmatprep.mubr.f32.mxu0 %v2784_v7  ;;  %2414 = vmatpush1.bf16.msk.msra.mxu0 %vm2923_vm2, %v2412_v44  ;;  %v2171_v44 = vld [vmem:[%s3941_s3 + $0x138] sm:$0xff] }
  0x33   : > { %2416 = vmatprep.subr.bf16.mxu0 %v2415_v45  ;;  %2440 = vmatprep.subr.bf16.mxu1 %v2439_v40  ;;  %v2173_v45 = vld [vmem:[%s3941_s3 + $0x148] sm:$0xff] }
  0x34   : > { %2442 = vmatpush1.bf16.msra.mxu1 %v2441_v43 }
  0x35   : > { %2121 = vmatmul.mubr.msk.f32.gmra.mrb[4].mxu0 %vm353_vm3, %v332_v46  ;;  %v2443_v46 = vpack.c.bf16 %v2173_v45, %v2171_v44 }
  0x36   : > { %642 = vmatprep.mubr.f32.mxu0 %v2784_v7 }
  0x37   : > { %2444 = vmatprep.subr.bf16.mxu1 %v2443_v46 }
  0x38   : > { %2446 = vmatpush1.bf16.msra.mxu1 %v2445_v50 }
  0x39   : > { %2132 = vmatmul.mubr.msk.f32.vlgmr.msra.gmra.mrb[0].mxu0 %vm353_vm3, %v551_v51  ;;  %v2175_v51 = vld [vmem:[%s3941_s3 + $0x158] sm:$0xff] }
  0x3a   : > { %2418 = vmatpush1.bf16.msra.mxu0 %v2417_v52  ;;  %648 = vmatprep.mubr.f32.mxu0 %v2784_v7  ;;  %v2177_v52 = vld [vmem:[%s3941_s3 + $0x168] sm:$0xff] }
  0x3b   : > { %2421 = vmatprep.subr.msk.bf16.mxu0 %vm2923_vm2, %v2419_v53  ;;  %v2447_v54 = vpack.c.bf16 %v2177_v52, %v2175_v51 }
  0x3d   : > { %2133 = vmatmul.mubr.msk.f32.gmra.mrb[2].mxu0 %vm353_vm3, %v552_v58  ;;  %2448 = vmatprep.subr.bf16.mxu1 %v2447_v54 }
  0x3e   : > { %654 = vmatprep.mubr.f32.mxu0 %v2784_v7  ;;  %2424 = vmatpush1.bf16.msk.msra.mxu0 %vm2923_vm2, %v2422_v59  ;;  %v2179_v59 = vld [vmem:[%s3941_s3 + $0x178] sm:$0xff] }
  0x3f   : > { %2426 = vmatprep.subr.bf16.mxu0 %v2425_v60  ;;  %2450 = vmatpush1.bf16.msra.mxu1 %v2449_v57  ;;  %v2181_v60 = vld [vmem:[%s3941_s3 + $0x188] sm:$0xff] }
  0x41   : > { %2134 = vmatmul.mubr.msk.f32.gmra.mrb[4].mxu0 %vm353_vm3, %v553_v61  ;;  %v2451_v61 = vpack.c.bf16 %v2181_v60, %v2179_v59 }
  0x42   : > { %758 = vmatprep.mubr.f32.mxu0 %v2784_v7 }
  0x43   : > { %2452 = vmatprep.subr.bf16.mxu1 %v2451_v61 }
  0x44   : > { %2454 = vmatpush1.bf16.msra.mxu1 %v2453_v0 }
  0x45   : > { %2145 = vmatmul.mubr.msk.f32.vlgmr.msra.gmra.mrb[0].mxu0 %vm353_vm3, %v667_v2  ;;  %v2185_v2 = vld [vmem:[%s3941_s3 + $0x1a8] sm:$0xff] }
  0x46   : > { %2428 = vmatpush1.bf16.msra.mxu0 %v2427_v3  ;;  %764 = vmatprep.mubr.f32.mxu0 %v2784_v7  ;;  %v2455_v3 = vpack.c.bf16 %v2185_v2, %v2183_v1 }
  0x47   : > { %2431 = vmatprep.subr.msk.bf16.mxu0 %vm2923_vm2, %v2429_v4  ;;  %v2182_v4 = vld [vmem:[%s3941_s3 + $0x190] sm:$0xff] }
  0x48   : > { %v2457_v6 = vpack.c.bf16 %v2184_v5, %v2182_v4  ;;  %2456 = vmatprep.subr.bf16.mxu1 %v2455_v3 }
  0x49   : > { %2146 = vmatmul.mubr.msk.f32.gmra.mrb[2].mxu0 %vm353_vm3, %v668_v8  ;;  %v2187_v8 = vld [vmem:[%s3941_s3 + $0x1b8] sm:$0xff] }
  0x4a   : > { %770 = vmatprep.mubr.f32.mxu0 %v2784_v7  ;;  %2434 = vmatpush1.bf16.msk.msra.mxu0 %vm2923_vm2, %v2432_v9  ;;  %v2189_v9 = vld [vmem:[%s3941_s3 + $0x1c8] sm:$0xff]  ;;  %vm1131_vm2 = vcmask 1041408  }
  0x4b   : > { %2458 = vmatpush1.bf16.msra.mxu1 %v2457_v6 }
  0x4d   : > { %2147 = vmatmul.mubr.msk.f32.gmra.mrb[4].mxu0 %vm353_vm3, %v669_v11  ;;  %v2459_v11 = vpack.c.bf16 %v2189_v9, %v2187_v8 }
  0x4e   : > { %874 = vmatprep.mubr.f32.mxu0 %v2784_v7 }
  0x4f   : > { %2460 = vmatprep.subr.bf16.mxu1 %v2459_v11 }
  0x51   : > { %2158 = vmatmul.mubr.msk.f32.vlgmr.msra.gmra.mrb[0].mxu0 %vm353_vm3, %v783_v12  ;;  %v2186_v12 = vld [vmem:[%s3941_s3 + $0x1b0] sm:$0xff] }
  0x52   : > { %880 = vmatprep.mubr.f32.mxu0 %v2784_v7 }
  0x55   : > { %2159 = vmatmul.mubr.msk.f32.gmra.mrb[2].mxu0 %vm353_vm3, %v784_v13  ;;  %v2188_v13 = vld [vmem:[%s3941_s3 + $0x1c0] sm:$0xff] }
  0x56   : > { %886 = vmatprep.mubr.f32.mxu0 %v2784_v7 }
  0x59   : > { %2160 = vmatmul.mubr.msk.f32.gmra.mrb[4].mxu0 %vm353_vm3, %v785_v14  ;;  %v2461_v14 = vpack.c.bf16 %v2188_v13, %v2186_v12  ;;  %vm1133_vm3 = vcmask 1042432  }
  0x5b   : > { %2462 = vmatpush1.bf16.msra.mxu1 %v2461_v14 }
 0x124   : > { %v876_v10 = vpop.f32.mrb[0].mxu0 }
 0x125   : > { %902 = vrot.lane.b32.xlu0 %v876_v10, %s3954_s28  ;;  %v878_v15 = vpop.f32.mrb[1].mxu0 }
 0x126   : > { %917 = vrot.lane.b32.xlu1 %v878_v15, %s3954_s28 }
 0x128   : > { %v882_v16 = vpop.f32.mrb[2].mxu0 }
 0x129   : > { %904 = vrot.lane.b32.xlu0 %v882_v16, %s3954_s28  ;;  %v884_v17 = vpop.f32.mrb[3].mxu0 }
 0x12c   : > { %v3102_v18 = vpop.f32.mrb[4].mxu0 }
 0x12d   : > { %919 = vrot.lane.b32.xlu0 %v884_v17, %s3954_s28  ;;  %906 = vrot.lane.b32.xlu1 %v3102_v18, %s3954_s28  ;;  %v3107_v19 = vpop.f32.mrb[5].mxu0 }
 0x131   : > { %921 = vrot.lane.b32.xlu1 %v3107_v19, %s3954_s28 }
 0x197   : > { %v903_v20 = vpop.permute.xlu0 %902 }
 0x198   : > { %v3111_v21 = vmax.f32 %v876_v10, %v903_v20  ;;  %v918_v22 = vpop.permute.xlu1 %917 }
 0x199   : > { %v927_v23 = vmax.f32 %v878_v15, %v918_v22  ;;  %v926_v24 = vmax.f32 %v876_v10, %v918_v22  ;;  %v2191_v10 = vld [vmem:[%s3941_s3 + $0x1d8] sm:$0xff]  ;;  %v1155_v15 = vld [vmem:[%s3941_s3 + $0x8] sm:$0xff] }
 0x19a   : > { %935 = vrot.lane.b32.xlu0 %v3111_v21, %s3954_s28  ;;  %944 = vrot.lane.b32.xlu1 %v3111_v21, %s3952_s26 }
 0x19b   : > { %v905_v25 = vpop.permute.xlu0 %904  ;;  %1251 = vmatprep.subr.mxu1 %v2191_v10 }
 0x19c   : > { %v3130_v26 = vmax.f32 %v882_v16, %v905_v25 }
 0x19e   : > { %953 = vrot.lane.b32.xlu0 %v3111_v21, %s3951_s25  ;;  %971 = vrot.lane.b32.xlu1 %v3111_v21, %s3950_s29 }
 0x19f   : > { %v920_v27 = vpop.permute.xlu0 %919  ;;  %v907_v35 = vpop.permute.xlu1 %906 }
 0x1a0   : > { %v3140_v28 = vmax.f32 %v884_v17, %v920_v27  ;;  %v928_v29 = vmax.f32 %v882_v16, %v920_v27  ;;  %v3172_v39 = vmax.f32 %v3102_v18, %v907_v35  ;;  %v1157_v16 = vld [vmem:[%s3941_s3 + $0x18] sm:$0xff]  ;;  %v2190_v17 = vld [vmem:[%s3941_s3 + $0x1d0] sm:$0xff] }
 0x1a1   : > { %1252 = vmatpush1.msra.mxu1 %v2190_v17 }
 0x1a2   : > { %962 = vrot.lane.b32.xlu0 %v3111_v21, %s3955_s14  ;;  %988 = vrot.lane.b32.xlu1 %v927_v23, %s3962_s16 }
 0x1a3   : > { %v922_v49 = vpop.permute.xlu1 %921 }
 0x1a4   : > { %v930_v53 = vmax.f32 %v3102_v18, %v922_v49  ;;  %v931_v58 = vmax.f32 %v3107_v19, %v922_v49  ;;  %v2463_v18 = vpack.c.bf16 %v1157_v16, %v1155_v15 }
 0x1a6   : > { %986 = vrot.lane.b32.xlu0 %v926_v24, %s3962_s16  ;;  %1014 = vrot.lane.b32.xlu1 %v927_v23, %s3961_s17 }
 0x1a7   : > { %2464 = vmatprep.subr.bf16.mxu1 %v2463_v18 }
 0x1aa   : > { %1005 = vrot.lane.b32.xlu0 %v927_v23, %s3959_s21  ;;  %1023 = vrot.lane.b32.xlu1 %v927_v23, %s3960_s22 }
 0x1ae   : > { %1041 = vrot.lane.b32.xlu0 %v927_v23, %s3948_s23  ;;  %1032 = vrot.lane.b32.xlu1 %v927_v23, %s3957_s24  ;;  %s3975_s23 = smov 88  }
 0x1b2   : > { %946 = vrot.lane.b32.xlu0 %v3130_v26, %s3952_s26  ;;  %937 = vrot.lane.b32.xlu1 %v3130_v26, %s3954_s28  ;;  %s2800_s28 = smov 112  }
 0x1b6   : > { %973 = vrot.lane.b32.xlu0 %v3130_v26, %s3950_s29  ;;  %955 = vrot.lane.b32.xlu1 %v3130_v26, %s3951_s25  ;;  %s3972_s25 = smov 28   ;;  %s3973_s29 = smov 118  }
 0x1ba   : > { %992 = vrot.lane.b32.xlu0 %v3140_v28, %s3962_s16  ;;  %964 = vrot.lane.b32.xlu1 %v3130_v26, %s3955_s14 }
 0x1be   : > { %1007 = vrot.lane.b32.xlu0 %v3140_v28, %s3959_s21  ;;  %990 = vrot.lane.b32.xlu1 %v928_v29, %s3962_s16  ;;  %s3976_s16 = smov 98   ;;  %s3977_s21 = smov 68  }
 0x1c2   : > { %1025 = vrot.lane.b32.xlu0 %v3140_v28, %s3960_s22  ;;  %1016 = vrot.lane.b32.xlu1 %v3140_v28, %s3961_s17  ;;  %s2799_s22 = smov 80  }
 0x1c6   : > { %1034 = vrot.lane.b32.xlu0 %v3140_v28, %s3972_s25  ;;  %939 = vrot.lane.b32.xlu1 %v3172_v39, %s3973_s29  ;;  %s3974_s29 = smov 108  }
 0x1ca   : > { %948 = vrot.lane.b32.xlu0 %v3172_v39, %s3974_s29  ;;  %966 = vrot.lane.b32.xlu1 %v3172_v39, %s3975_s23 }
 0x1ce   : > { %957 = vrot.lane.b32.xlu0 %v3172_v39, %s3976_s16  ;;  %994 = vrot.lane.b32.xlu1 %v930_v53, %s3977_s21 }
 0x1d2   : > { %975 = vrot.lane.b32.xlu0 %v3172_v39, %s3978_s0  ;;  %1018 = vrot.lane.b32.xlu1 %v931_v58, %s3979_s1  ;;  %s3980_s1 = smov 38   ;;  %s3981_s0 = smov 58  }
 0x1d6   : > { %996 = vrot.lane.b32.xlu0 %v931_v58, %s3977_s21  ;;  %1027 = vrot.lane.b32.xlu1 %v931_v58, %s3980_s1  ;;  %s2290_s1 = sshll.u32 %s2874_s13, 4  ;;  %s2802_s13 = smov [#allocation2]  }
 0x1d7   : > { %s3896_s26 = scalar_lea.hbm %s3947_s9, %s2290_s1  ;;  %s2724_s24 = sshll.u32 %s2802_s13, 4  ;;  %s2725_s24 = int_to_ptr.vmem [resolvable:$false] %s2724_s24 }
 0x1da   : > { %1009 = vrot.lane.b32.xlu0 %v931_v58, %s3981_s0  ;;  %1036 = vrot.lane.b32.xlu1 %v931_v58, %s3972_s25  ;;  %s3982_s25 = smov 18   ;;  %s323_s0 = sand.u32 1, %s2774_s10  }
 0x1db   : > { %s324_s27 = scalar_lea.vmem [#allocation2], %s323_s0  ;;  %s2031_s14 = scalar_lea.sflag [#allocation3], %s323_s0 }
 0x1de   : > { %1043 = vrot.lane.b32.xlu0 %v3140_v28, %s3982_s25  ;;  %1045 = vrot.lane.b32.xlu1 %v931_v58, %s3982_s25  ;;  %s2726_s25 = scalar_lea.vmem %s2725_s24, 32 }
 0x20c   : > { %v936_v19 = vpop.permute.xlu0 %935  ;;  %v945_v20 = vpop.permute.xlu1 %944 }
 0x20d   : > { %v1051_v37 = vsel %vm1050_vm4, %v3111_v21, %v936_v19 }
 0x20e   : > { %v1055_v41 = vsel %vm1054_vm5, %v1051_v37, %v945_v20 }
 0x210   : > { %v954_v22 = vpop.permute.xlu0 %953  ;;  %v972_v23 = vpop.permute.xlu1 %971 }
 0x211   : > { %v1059_v42 = vsel %vm1058_vm6, %v1055_v41, %v954_v22 }
 0x214   : > { %v963_v24 = vpop.permute.xlu0 %962  ;;  %v989_v25 = vpop.permute.xlu1 %988 }
 0x215   : > { %v1063_v45 = vsel %vm1062_vm7, %v1059_v42, %v963_v24 }
 0x216   : > { %v1067_v21 = vsel %vm1066_vm9, %v1063_v45, %v972_v23 }
 0x218   : > { %v987_v27 = vpop.permute.xlu0 %986  ;;  %v1015_v29 = vpop.permute.xlu1 %1014 }
 0x219   : > { %v999_v46 = vsel %vm998_vm8, %v987_v27, %v989_v25 }
 0x21a   : > { %v1071_v49 = vsel %vm1070_vm10, %v1067_v21, %v999_v46 }
 0x21c   : > { %v1006_v30 = vpop.permute.xlu0 %1005  ;;  %v1024_v31 = vpop.permute.xlu1 %1023 }
 0x21d   : > { %v1075_v50 = vsel %vm1074_vm11, %v1071_v49, %v1006_v30 }
 0x21e   : > { %v1079_v53 = vsel %vm1078_vm12, %v1075_v50, %v1015_v29 }
 0x21f   : > { %v1083_v54 = vsel %vm1082_vm13, %v1079_v53, %v1024_v31 }
 0x220   : > { %v1042_v32 = vpop.permute.xlu0 %1041  ;;  %v1033_v33 = vpop.permute.xlu1 %1032 }
 0x221   : > { %v1087_v58 = vsel %vm1086_vm14, %v1083_v54, %v1033_v33 }
 0x222   : > { %v1091_v63 = vsel %vm1090_vm15, %v1087_v58, %v1042_v32  ;;  %v1156_v58 = vld [vmem:[%s3941_s3 + $0x10] sm:$0xff] }
 0x223   : > { %v1095_v4 = vrot.slane %v1091_v63, 1 }
 0x224   : > { %v947_v34 = vpop.permute.xlu0 %946  ;;  %v938_v35 = vpop.permute.xlu1 %937 }
 0x225   : > { %v1052_v57 = vsel %vm1050_vm4, %v3130_v26, %v938_v35  ;;  %v1097_v13 = vmax.f32 %v1091_v63, %v1095_v4  ;;  %v1160_v4 = vld [vmem:[%s3941_s3 + $0x30] sm:$0xff] }
 0x226   : > { %v1056_v59 = vsel %vm1054_vm5, %v1052_v57, %v947_v34 }
 0x227   : > { %v1107_v20 = vrot.slane %v1097_v13, 1  ;;  %v1109_v27 = vrot.slane %v1097_v13, 2  ;;  %v1111_v41 = vrot.slane %v1097_v13, 3 }
 0x228   : > { %v974_v36 = vpop.permute.xlu0 %973  ;;  %v956_v28 = vpop.permute.xlu1 %955 }
 0x229   : > { %v1060_v62 = vsel %vm1058_vm6, %v1056_v59, %v956_v28  ;;  %v1130_v33 = vsel %vm1129_vm1, %v1097_v13, %v1107_v20  ;;  %v1159_v59 = vld [vmem:[%s3941_s3 + $0x28] sm:$0xff] }
 0x22a   : > { %v1132_v37 = vsel %vm1131_vm2, %v1130_v33, %v1109_v27  ;;  %v1177_v33 = vld [vmem:[%s3941_s3 + $0xb8] sm:$0xff] }
 0x22b   : > { %v1134_v46 = vsel %vm1133_vm3, %v1132_v37, %v1111_v41  ;;  %v1179_v37 = vld [vmem:[%s3941_s3 + $0xc8] sm:$0xff] }
 0x22c   : > { %v993_v38 = vpop.permute.xlu0 %992  ;;  %v965_v40 = vpop.permute.xlu1 %964 }
 0x22d   : > { %v1064_v0 = vsel %vm1062_vm7, %v1060_v62, %v965_v40 }
 0x22e   : > { %v1068_v26 = vsel %vm1066_vm9, %v1064_v0, %v974_v36 }
 0x230   : > { %v1008_v43 = vpop.permute.xlu0 %1007  ;;  %v991_v44 = vpop.permute.xlu1 %990 }
 0x231   : > { %v1000_v1 = vsel %vm998_vm8, %v991_v44, %v993_v38 }
 0x232   : > { %v1072_v6 = vsel %vm1070_vm10, %v1068_v26, %v1000_v1 }
 0x233   : > { %v1076_v14 = vsel %vm1074_vm11, %v1072_v6, %v1008_v43 }
 0x234   : > { %v1026_v47 = vpop.permute.xlu0 %1025  ;;  %v1017_v48 = vpop.permute.xlu1 %1016 }
 0x235   : > { %v1080_v17 = vsel %vm1078_vm12, %v1076_v14, %v1017_v48 }
 0x236   : > { %v1084_v24 = vsel %vm1082_vm13, %v1080_v17, %v1026_v47  ;;  %v1164_v17 = vld [vmem:[%s3941_s3 + $0x50] sm:$0xff] }
 0x238   : > { %v1035_v51 = vpop.permute.xlu0 %1034  ;;  %v940_v52 = vpop.permute.xlu1 %939 }
 0x239   : > { %v1053_v5 = vsel %vm1050_vm4, %v3172_v39, %v940_v52  ;;  %v1088_v29 = vsel %vm1086_vm14, %v1084_v24, %v1035_v51  ;;  %vm1136_vm4 = vcmask 1044480   ;;  %v2161_v52 = vld [vmem:[%s3940_s2] ss:$0 sm:$0xff]  ;;  %v1171_v24 = vld [vmem:[%s3941_s3 + $0x88] sm:$0xff] }
 0x23c   : > { %v949_v55 = vpop.permute.xlu0 %948  ;;  %v967_v56 = vpop.permute.xlu1 %966 }
 0x23d   : > { %v1057_v8 = vsel %vm1054_vm5, %v1053_v5, %v949_v55  ;;  %v1154_v55 = vld [vmem:[%s3941_s3] sm:$0xff] }
 0x23e   : > { %v2465_v1 = vpack.c.bf16 %v1156_v58, %v1154_v55  ;;  %v2198_v55 = vld [vmem:[%s3941_s3 + $0x200] sm:$0xff]  ;;  %v2205_v58 = vld [vmem:[%s3941_s3 + $0x238] sm:$0xff] }
 0x240   : > { %v958_v60 = vpop.permute.xlu0 %957  ;;  %v995_v61 = vpop.permute.xlu1 %994 }
 0x241   : > { %v1061_v9 = vsel %vm1058_vm6, %v1057_v8, %v958_v60  ;;  %vm1138_vm6 = vcmask 1045504   ;;  %v1161_v60 = vld [vmem:[%s3941_s3 + $0x38] sm:$0xff] }
 0x242   : > { %v1065_v15 = vsel %vm1062_vm7, %v1061_v9, %v967_v56 }
 0x244   : > { %v976_v2 = vpop.permute.xlu0 %975  ;;  %v1019_v3 = vpop.permute.xlu1 %1018 }
 0x245   : > { %v1069_v16 = vsel %vm1066_vm9, %v1065_v15, %v976_v2  ;;  %vm1140_vm9 = vcmask 1046528   ;;  %v2467_v2 = vpack.c.bf16 %v1161_v60, %v1159_v59 }
 0x248   : > { %v997_v11 = vpop.permute.xlu0 %996  ;;  %v1028_v12 = vpop.permute.xlu1 %1027 }
 0x249   : > { %v1001_v10 = vsel %vm998_vm8, %v995_v61, %v997_v11  ;;  %v1163_v11 = vld [vmem:[%s3941_s3 + $0x48] sm:$0xff] }
 0x24a   : > { %v1073_v18 = vsel %vm1070_vm10, %v1069_v16, %v1001_v10  ;;  %v1162_v16 = vld [vmem:[%s3941_s3 + $0x40] sm:$0xff] }
 0x24c   : > { %v1010_v39 = vpop.permute.xlu0 %1009  ;;  %v1037_v19 = vpop.permute.xlu1 %1036 }
 0x24d   : > { %v1077_v22 = vsel %vm1074_vm11, %v1073_v18, %v1010_v39  ;;  %vm1220_vm11 = vcmask 982016   ;;  %v1167_v39 = vld [vmem:[%s3941_s3 + $0x68] sm:$0xff]  ;;  %v1169_v18 = vld [vmem:[%s3941_s3 + $0x78] sm:$0xff] }
 0x24e   : > { %v1081_v23 = vsel %vm1078_vm12, %v1077_v22, %v1019_v3  ;;  %v1158_v3 = vld [vmem:[%s3941_s3 + $0x20] sm:$0xff]  ;;  %v2475_v20 = vpack.c.bf16 %v1169_v18, %v1167_v39 }
 0x24f   : > { %v1085_v25 = vsel %vm1082_vm13, %v1081_v23, %v1028_v12  ;;  %v1165_v12 = vld [vmem:[%s3941_s3 + $0x58] sm:$0xff]  ;;  %v2469_v10 = vpack.c.bf16 %v1160_v4, %v1158_v3  ;;  %v1166_v22 = vld [vmem:[%s3941_s3 + $0x60] sm:$0xff]  ;;  %v1168_v23 = vld [vmem:[%s3941_s3 + $0x70] sm:$0xff] }
 0x250   : > { %v1089_v30 = vsel %vm1086_vm14, %v1085_v25, %v1037_v19  ;;  %v1044_v31 = vpop.permute.xlu0 %1043  ;;  %v1046_v32 = vpop.permute.xlu1 %1045  ;;  %v2471_v15 = vpack.c.bf16 %v1165_v12, %v1163_v11  ;;  %v2473_v19 = vpack.c.bf16 %v1164_v17, %v1162_v16  ;;  %v1173_v25 = vld [vmem:[%s3941_s3 + $0x98] sm:$0xff]  ;;  %v2477_v27 = vpack.c.bf16 %v1168_v23, %v1166_v22  ;;  %v2210_v12 = vld [vmem:[%s3941_s3 + $0x260] sm:$0xff] }
 0x251   : > { %v1092_v34 = vsel %vm1090_vm15, %v1088_v29, %v1044_v31  ;;  %v1093_v35 = vsel %vm1090_vm15, %v1089_v30, %v1046_v32  ;;  %v2479_v29 = vpack.c.bf16 %v1173_v25, %v1171_v24  ;;  %v1170_v30 = vld [vmem:[%s3941_s3 + $0x80] sm:$0xff]  ;;  %v1172_v31 = vld [vmem:[%s3941_s3 + $0x90] sm:$0xff]  ;;  %v1175_v32 = vld [vmem:[%s3941_s3 + $0xa8] sm:$0xff] }
 0x252   : > { %v1099_v36 = vrot.slane %v1092_v34, 1  ;;  %v1103_v28 = vrot.slane %v1093_v35, 1  ;;  %v2217_v16 = vld [vmem:[%s3941_s3 + $0x298] sm:$0xff]  ;;  %v2214_v18 = vld [vmem:[%s3941_s3 + $0x280] sm:$0xff] }
 0x253   : > { %v2221_v22 = vld [vmem:[%s3941_s3 + $0x2b8] sm:$0xff]  ;;  %v2218_v25 = vld [vmem:[%s3941_s3 + $0x2a0] sm:$0xff] }
 0x254   : > { %v1101_v38 = vmax.f32 %v1092_v34, %v1099_v36  ;;  %v1105_v40 = vmax.f32 %v1093_v35, %v1103_v28  ;;  %v2481_v34 = vpack.c.bf16 %v1172_v31, %v1170_v30  ;;  %v2483_v35 = vpack.c.bf16 %v1177_v33, %v1175_v32  ;;  %v1174_v36 = vld [vmem:[%s3941_s3 + $0xa0] sm:$0xff]  ;;  %v1176_v28 = vld [vmem:[%s3941_s3 + $0xb0] sm:$0xff]  ;;  %v2223_v30 = vld [vmem:[%s3941_s3 + $0x2c8] sm:$0xff] }
 0x255   : > { %v2226_v31 = vld [vmem:[%s3941_s3 + $0x2d8] sm:$0xff]  ;;  %v2228_v32 = vld [vmem:[%s3941_s3 + $0x2e8] sm:$0xff]  ;;  %v2225_v33 = vld [vmem:[%s3941_s3 + $0x2d0] sm:$0xff] }
 0x256   : > { %v1114_v42 = vrot.slane %v1101_v38, 4  ;;  %v1116_v43 = vrot.slane %v1101_v38, 5  ;;  %v1123_v44 = vrot.slane %v1105_v40, 1  ;;  %v1125_v45 = vrot.slane %v1105_v40, 2 }
 0x257   : > { %v1118_v21 = vrot.slane %v1101_v38, 6  ;;  %v1120_v48 = vrot.slane %v1101_v38, 7  ;;  %v1127_v49 = vrot.slane %v1105_v40, 3  ;;  %v1181_v38 = vld [vmem:[%s3941_s3 + $0xd8] sm:$0xff] }
 0x258   : > { %v1135_v47 = vsel %vm363_vm0, %v1134_v46, %v1114_v42  ;;  %v1142_v50 = vsel %vm1129_vm1, %v1105_v40, %v1123_v44  ;;  %v2485_v40 = vpack.c.bf16 %v1176_v28, %v1174_v36  ;;  %v2487_v41 = vpack.c.bf16 %v1181_v38, %v1179_v37  ;;  %v1178_v42 = vld [vmem:[%s3941_s3 + $0xc0] sm:$0xff]  ;;  %v2195_v46 = vld [vmem:[%s3941_s3 + $0x1e8] sm:$0xff]  ;;  %v2230_v28 = vld [vmem:[%s3941_s3 + $0x2f8] sm:$0xff] }
 0x259   : > { %v1137_v51 = vsel %vm1136_vm4, %v1135_v47, %v1116_v43  ;;  %v1143_v53 = vsel %vm1131_vm2, %v1142_v50, %v1125_v45  ;;  %v1180_v43 = vld [vmem:[%s3941_s3 + $0xd0] sm:$0xff]  ;;  %v1183_v45 = vld [vmem:[%s3941_s3 + $0xe8] sm:$0xff]  ;;  %v2194_v47 = vld [vmem:[%s3941_s3 + $0x1e0] sm:$0xff] }
 0x25a   : > { %v1139_v54 = vsel %vm1138_vm6, %v1137_v51, %v1118_v21  ;;  %v1144_v57 = vsel %vm1133_vm3, %v1143_v53, %v1127_v49  ;;  %v2489_v44 = vpack.c.bf16 %v1180_v43, %v1178_v42  ;;  %v2197_v21 = vld [vmem:[%s3941_s3 + $0x1f8] sm:$0xff]  ;;  %v2199_v49 = vld [vmem:[%s3941_s3 + $0x208] sm:$0xff]  ;;  %v1182_v51 = vld [vmem:[%s3941_s3 + $0xe0] sm:$0xff] }
 0x25b   : > { %v1141_v56 = vsel %vm1140_vm9, %v1139_v54, %v1120_v48  ;;  %v3341_v62 = vadd.f32 %v2161_v52, %v1144_v57  ;;  %v2196_v48 = vld [vmem:[%s3941_s3 + $0x1f0] sm:$0xff]  ;;  %v2201_v50 = vld [vmem:[%s3941_s3 + $0x218] sm:$0xff]  ;;  %v2203_v57 = vld [vmem:[%s3941_s3 + $0x228] sm:$0xff] }
 0x25c   : > { %v3339_v61 = vadd.f32 %v2161_v52, %v1141_v56  ;;  %v2491_v52 = vpack.c.bf16 %v2197_v21, %v2195_v46  ;;  %v2493_v53 = vpack.c.bf16 %v2196_v48, %v2194_v47  ;;  %v2495_v54 = vpack.c.bf16 %v2201_v50, %v2199_v49  ;;  %v2200_v56 = vld [vmem:[%s3941_s3 + $0x210] sm:$0xff]  ;;  %v2232_v37 = vld [vmem:[%s3941_s3 + $0x308] sm:$0xff]  ;;  %v2222_v38 = vld [vmem:[%s3941_s3 + $0x2c0] sm:$0xff] }
 0x25d   : > { %v1218_v0 = vrot.slane %v3341_v62, 1  ;;  %v1508_v5 = vrot.slane %v3341_v62, 3  ;;  %v1617_v8 = vrot.slane %v3341_v62, 4  ;;  %v2497_v59 = vpack.c.bf16 %v2200_v56, %v2198_v55  ;;  %v2233_v47 = vld [vmem:[%s3941_s3 + $0x310] sm:$0xff]  ;;  %v2235_v48 = vld [vmem:[%s3941_s3 + $0x320] sm:$0xff]  ;;  %v2238_v49 = vld [vmem:[%s3941_s3 + $0x338] sm:$0xff] }
 0x25e   : > { %v1217_v63 = vrot.slane %v3339_v61, 1  ;;  %v1507_v26 = vrot.slane %v3339_v61, 3  ;;  %v1616_v6 = vrot.slane %v3339_v61, 4  ;;  %v2499_v60 = vpack.c.bf16 %v2205_v58, %v2203_v57  ;;  %v2240_v50 = vld [vmem:[%s3941_s3 + $0x348] sm:$0xff]  ;;  %v2242_v55 = vld [vmem:[%s3941_s3 + $0x358] sm:$0xff] }
 0x25f   : > { %v1399_v36 = vrot.slane %v3341_v62, 2  ;;  %v2523_v42 = vpack.c.bf16 %v2232_v37, %v2230_v28  ;;  %v2231_v62 = vld [vmem:[%s3941_s3 + $0x300] sm:$0xff]  ;;  %v2244_v56 = vld [vmem:[%s3941_s3 + $0x368] sm:$0xff] }
 0x260   : > { %v1219_v9 = vsel %vm1140_vm9, %v1217_v63, %v1218_v0  ;;  %v3364_v13 = vsel %vm1136_vm4, %v1507_v26, %v1508_v5  ;;  %v3367_v14 = vsel %vm363_vm0, %v1616_v6, %v1617_v8  ;;  %v2202_v63 = vld [vmem:[%s3941_s3 + $0x220] sm:$0xff]  ;;  %v2204_v0 = vld [vmem:[%s3941_s3 + $0x230] sm:$0xff]  ;;  %v2211_v6 = vld [vmem:[%s3941_s3 + $0x268] sm:$0xff]  ;;  %v2535_v58 = vpack.c.bf16 %v2244_v56, %v2242_v55 }
 0x261   : > { %2192 = vmatmul.mubr.msk.f32.vlgmr.msra.gmra.mrb[0].mxu1 %vm1220_vm11, %v1219_v9  ;;  %v2501_v3 = vpack.c.bf16 %v2204_v0, %v2202_v63  ;;  %v2206_v26 = vld [vmem:[%s3941_s3 + $0x240] sm:$0xff]  ;;  %v2208_v5 = vld [vmem:[%s3941_s3 + $0x250] sm:$0xff]  ;;  %v2213_v8 = vld [vmem:[%s3941_s3 + $0x278] sm:$0xff]  ;;  %vm1759_vm0 = vcmask 261120  }
 0x262   : > { %2466 = vmatpush1.bf16.msra.mxu1 %v2465_v1  ;;  %1360 = vmatprep.mubr.f32.mxu1 %v2784_v7  ;;  %v2207_v1 = vld [vmem:[%s3941_s3 + $0x248] sm:$0xff]  ;;  %v2505_v9 = vpack.c.bf16 %v2208_v5, %v2206_v26  ;;  %v2507_v11 = vpack.c.bf16 %v2213_v8, %v2211_v6  ;;  %v2246_v63 = vld [vmem:[%s3941_s3 + $0x378] sm:$0xff]  ;;  %v2268_v37 = vld [vmem:[%s3941_s3 + $0x420] sm:$0xff] }
 0x263   : > { %2468 = vmatprep.subr.bf16.mxu1 %v2467_v2  ;;  %v2209_v2 = vld [vmem:[%s3941_s3 + $0x258] sm:$0xff]  ;;  %v2248_v0 = vld [vmem:[%s3941_s3 + $0x388] sm:$0xff] }
 0x264   : > { %v2503_v4 = vpack.c.bf16 %v2209_v2, %v2207_v1  ;;  %v2539_v2 = vpack.c.bf16 %v2248_v0, %v2246_v63  ;;  %v2250_v26 = vld [vmem:[%s3941_s3 + $0x398] sm:$0xff]  ;;  %v2252_v5 = vld [vmem:[%s3941_s3 + $0x3a8] sm:$0xff] }
 0x265   : > { %v2543_v8 = vpack.c.bf16 %v2252_v5, %v2250_v26  ;;  %v2285_v56 = vld [vmem:[%s3941_s3 + $0x4a8] sm:$0xff] }
 0x266   : > { %2470 = vmatpush1.bf16.msra.mxu1 %v2469_v10  ;;  %v2212_v10 = vld [vmem:[%s3941_s3 + $0x270] sm:$0xff]  ;;  %v1764_v5 = vld [vmem:[%s3943_s5 + $0x8] sm:$0xff] }
 0x267   : > { %2472 = vmatprep.subr.bf16.mxu1 %v2471_v15  ;;  %v2215_v15 = vld [vmem:[%s3941_s3 + $0x288] sm:$0xff]  ;;  %v2509_v17 = vpack.c.bf16 %v2212_v10, %v2210_v12  ;;  %v2254_v10 = vld [vmem:[%s3941_s3 + $0x3b8] sm:$0xff] }
 0x268   : > { %v2511_v39 = vpack.c.bf16 %v2217_v16, %v2215_v15  ;;  %v2257_v15 = vld [vmem:[%s3941_s3 + $0x3c8] sm:$0xff]  ;;  %v2259_v16 = vld [vmem:[%s3941_s3 + $0x3d8] sm:$0xff] }
 0x26a   : > { %2474 = vmatpush1.bf16.msra.mxu1 %v2473_v19  ;;  %v2216_v19 = vld [vmem:[%s3941_s3 + $0x290] sm:$0xff] }
 0x26b   : > { %2476 = vmatprep.subr.bf16.mxu1 %v2475_v20  ;;  %v2219_v20 = vld [vmem:[%s3941_s3 + $0x2a8] sm:$0xff]  ;;  %v2513_v23 = vpack.c.bf16 %v2216_v19, %v2214_v18  ;;  %v2263_v19 = vld [vmem:[%s3941_s3 + $0x3f8] sm:$0xff] }
 0x26c   : > { %v2515_v24 = vpack.c.bf16 %v2221_v22, %v2219_v20  ;;  %v2261_v18 = vld [vmem:[%s3941_s3 + $0x3e8] sm:$0xff]  ;;  %v2253_v20 = vld [vmem:[%s3941_s3 + $0x3b0] sm:$0xff]  ;;  %v2547_v22 = vpack.c.bf16 %v2259_v16, %v2257_v15  ;;  %v1783_v15 = vld [vmem:[%s3943_s5 + $0xa0] sm:$0xff] }
 0x26d   : > { %v1784_v16 = vld [vmem:[%s3943_s5 + $0xa8] sm:$0xff] }
 0x26e   : > { %2478 = vmatpush1.bf16.msra.mxu1 %v2477_v27  ;;  %v2220_v27 = vld [vmem:[%s3941_s3 + $0x2b0] sm:$0xff] }
 0x26f   : > { %2480 = vmatprep.subr.bf16.mxu1 %v2479_v29  ;;  %v2517_v29 = vpack.c.bf16 %v2220_v27, %v2218_v25  ;;  %v2260_v25 = vld [vmem:[%s3941_s3 + $0x3e0] sm:$0xff]  ;;  %v2262_v27 = vld [vmem:[%s3941_s3 + $0x3f0] sm:$0xff] }
 0x272   : > { %2482 = vmatpush1.bf16.msra.mxu1 %v2481_v34  ;;  %v2227_v34 = vld [vmem:[%s3941_s3 + $0x2e0] sm:$0xff] }
 0x273   : > { %2484 = vmatprep.subr.bf16.mxu1 %v2483_v35  ;;  %v1398_v35 = vrot.slane %v3339_v61, 2 }
 0x275   : > { %v1400_v43 = vsel %vm1138_vm6, %v1398_v35, %v1399_v36  ;;  %v2269_v35 = vld [vmem:[%s3941_s3 + $0x428] sm:$0xff] }
 0x276   : > { %2486 = vmatpush1.bf16.msra.mxu1 %v2485_v40  ;;  %v2519_v40 = vpack.c.bf16 %v2228_v32, %v2226_v31  ;;  %v2553_v31 = vpack.c.bf16 %v2262_v27, %v2260_v25  ;;  %v1769_v25 = vld [vmem:[%s3943_s5 + $0x30] sm:$0xff]  ;;  %v1770_v27 = vld [vmem:[%s3943_s5 + $0x38] sm:$0xff] }
 0x277   : > { %2488 = vmatprep.subr.bf16.mxu1 %v2487_v41  ;;  %v2521_v41 = vpack.c.bf16 %v2227_v34, %v2225_v33  ;;  %v2264_v33 = vld [vmem:[%s3941_s3 + $0x400] sm:$0xff]  ;;  %v2266_v34 = vld [vmem:[%s3941_s3 + $0x410] sm:$0xff] }
 0x278   : > { %v2557_v36 = vpack.c.bf16 %v2266_v34, %v2264_v33  ;;  %v1771_v33 = vld [vmem:[%s3943_s5 + $0x40] sm:$0xff]  ;;  %v1772_v34 = vld [vmem:[%s3943_s5 + $0x48] sm:$0xff] }
 0x27a   : > { %2490 = vmatpush1.bf16.msra.mxu1 %v2489_v44  ;;  %v2234_v44 = vld [vmem:[%s3941_s3 + $0x318] sm:$0xff] }
 0x27b   : > { %1324 = vmatprep.subr.mxu1 %v1183_v45  ;;  %v2236_v45 = vld [vmem:[%s3941_s3 + $0x328] sm:$0xff] }
 0x27c   : > { %v2527_v21 = vpack.c.bf16 %v2236_v45, %v2234_v44  ;;  %v2277_v44 = vld [vmem:[%s3941_s3 + $0x468] sm:$0xff]  ;;  %v2279_v45 = vld [vmem:[%s3941_s3 + $0x478] sm:$0xff] }
 0x27e   : > { %1325 = vmatpush1.msra.mxu1 %v1182_v51  ;;  %v2529_v51 = vpack.c.bf16 %v2235_v48, %v2233_v47  ;;  %v2276_v47 = vld [vmem:[%s3941_s3 + $0x460] sm:$0xff]  ;;  %v2278_v48 = vld [vmem:[%s3941_s3 + $0x470] sm:$0xff] }
 0x27f   : > { %2193 = vmatmul.mubr.msk.f32.vlgmr.msra.gmra.mrb[0].mxu1 %vm1220_vm11, %v3339_v61  ;;  %2492 = vmatprep.subr.bf16.mxu1 %v2491_v52  ;;  %v2229_v61 = vld [vmem:[%s3941_s3 + $0x2f0] sm:$0xff]  ;;  %v2531_v52 = vpack.c.bf16 %v2240_v50, %v2238_v49  ;;  %v2281_v49 = vld [vmem:[%s3941_s3 + $0x488] sm:$0xff]  ;;  %v2283_v50 = vld [vmem:[%s3941_s3 + $0x498] sm:$0xff] }
 0x280   : > { %2494 = vmatpush1.bf16.msra.mxu1 %v2493_v53  ;;  %1467 = vmatprep.mubr.f32.mxu1 %v2784_v7  ;;  %v2525_v46 = vpack.c.bf16 %v2231_v62, %v2229_v61  ;;  %v2237_v53 = vld [vmem:[%s3941_s3 + $0x330] sm:$0xff]  ;;  %v2272_v62 = vld [vmem:[%s3941_s3 + $0x440] sm:$0xff] }
 0x281   : > { %2496 = vmatprep.subr.bf16.mxu1 %v2495_v54  ;;  %v2239_v54 = vld [vmem:[%s3941_s3 + $0x340] sm:$0xff] }
 0x282   : > { %v2533_v57 = vpack.c.bf16 %v2239_v54, %v2237_v53  ;;  %v2280_v53 = vld [vmem:[%s3941_s3 + $0x480] sm:$0xff]  ;;  %v2282_v54 = vld [vmem:[%s3941_s3 + $0x490] sm:$0xff] }
 0x283   : > { %v2573_v55 = vpack.c.bf16 %v2282_v54, %v2280_v53  ;;  %v1794_v53 = vld [vmem:[%s3943_s5 + $0xf8] sm:$0xff] }
 0x284   : > { %2498 = vmatpush1.bf16.msra.mxu1 %v2497_v59  ;;  %v2241_v59 = vld [vmem:[%s3941_s3 + $0x350] sm:$0xff] }
 0x285   : > { %2500 = vmatprep.subr.bf16.mxu1 %v2499_v60  ;;  %v2243_v60 = vld [vmem:[%s3941_s3 + $0x360] sm:$0xff] }
 0x286   : > { %v2537_v1 = vpack.c.bf16 %v2243_v60, %v2241_v59 }
 0x288   : > { %2502 = vmatpush1.bf16.msra.mxu1 %v2501_v3  ;;  %v2245_v3 = vld [vmem:[%s3941_s3 + $0x370] sm:$0xff] }
 0x289   : > { %2504 = vmatprep.subr.bf16.mxu1 %v2503_v4  ;;  %v2247_v4 = vld [vmem:[%s3941_s3 + $0x380] sm:$0xff] }
 0x28a   : > { %v2541_v6 = vpack.c.bf16 %v2247_v4, %v2245_v3  ;;  %v1780_v3 = vld [vmem:[%s3943_s5 + $0x88] sm:$0xff]  ;;  %v1763_v4 = vld [vmem:[%s3943_s5] sm:$0xff] }
 0x28c   : > { %2506 = vmatpush1.bf16.msra.mxu1 %v2505_v9  ;;  %v2249_v9 = vld [vmem:[%s3941_s3 + $0x390] sm:$0xff] }
 0x28d   : > { %2508 = vmatprep.subr.bf16.mxu1 %v2507_v11  ;;  %v2251_v11 = vld [vmem:[%s3941_s3 + $0x3a0] sm:$0xff] }
 0x28e   : > { %v2545_v12 = vpack.c.bf16 %v2251_v11, %v2249_v9  ;;  %v2577_v9 = vpack.c.bf16 %v1764_v5, %v1763_v4 }
 0x290   : > { %2510 = vmatpush1.bf16.msra.mxu1 %v2509_v17  ;;  %v2256_v17 = vld [vmem:[%s3941_s3 + $0x3c0] sm:$0xff] }
 0x291   : > { %2512 = vmatprep.subr.bf16.mxu1 %v2511_v39  ;;  %v2258_v39 = vld [vmem:[%s3941_s3 + $0x3d0] sm:$0xff] }
 0x294   : > { %2514 = vmatpush1.bf16.msra.mxu1 %v2513_v23  ;;  %v2549_v23 = vpack.c.bf16 %v2258_v39, %v2256_v17  ;;  %v2583_v39 = vpack.c.bf16 %v1784_v16, %v1783_v15 }
 0x295   : > { %2516 = vmatprep.subr.bf16.mxu1 %v2515_v24  ;;  %v2551_v24 = vpack.c.bf16 %v2263_v19, %v2261_v18  ;;  %v1767_v18 = vld [vmem:[%s3943_s5 + $0x20] sm:$0xff]  ;;  %v1768_v19 = vld [vmem:[%s3943_s5 + $0x28] sm:$0xff] }
 0x298   : > { %2518 = vmatpush1.bf16.msra.mxu1 %v2517_v29  ;;  %v2265_v29 = vld [vmem:[%s3941_s3 + $0x408] sm:$0xff] }
 0x299   : > { %1431 = vmatprep.subr.mxu1 %v2223_v30  ;;  %v2267_v30 = vld [vmem:[%s3941_s3 + $0x418] sm:$0xff] }
 0x29a   : > { %v2555_v32 = vpack.c.bf16 %v2267_v30, %v2265_v29  ;;  %v1787_v29 = vld [vmem:[%s3943_s5 + $0xc0] sm:$0xff]  ;;  %v1788_v30 = vld [vmem:[%s3943_s5 + $0xc8] sm:$0xff] }
 0x29c   : > { %1432 = vmatpush1.msra.mxu1 %v2222_v38  ;;  %v2270_v38 = vld [vmem:[%s3941_s3 + $0x430] sm:$0xff] }
 0x29d   : > { %2224 = vmatmul.mubr.msk.f32.vlgmr.msra.gmra.mrb[0].mxu1 %vm1220_vm11, %v1400_v43  ;;  %2520 = vmatprep.subr.bf16.mxu1 %v2519_v40  ;;  %v2273_v40 = vld [vmem:[%s3941_s3 + $0x448] sm:$0xff]  ;;  %v2274_v43 = vld [vmem:[%s3941_s3 + $0x450] sm:$0xff] }
 0x29e   : > { %2522 = vmatpush1.bf16.msra.mxu1 %v2521_v41  ;;  %1576 = vmatprep.mubr.f32.mxu1 %v2784_v7  ;;  %v2275_v41 = vld [vmem:[%s3941_s3 + $0x458] sm:$0xff] }
 0x29f   : > { %2524 = vmatprep.subr.bf16.mxu1 %v2523_v42  ;;  %v2561_v42 = vpack.c.bf16 %v2270_v38, %v2268_v37  ;;  %v2563_v61 = vpack.c.bf16 %v2275_v41, %v2273_v40  ;;  %v1773_v37 = vld [vmem:[%s3943_s5 + $0x50] sm:$0xff]  ;;  %v1774_v38 = vld [vmem:[%s3943_s5 + $0x58] sm:$0xff]  ;;  %v1791_v40 = vld [vmem:[%s3943_s5 + $0xe0] sm:$0xff] }
 0x2a0   : > { %v1792_v41 = vld [vmem:[%s3943_s5 + $0xe8] sm:$0xff] }
 0x2a2   : > { %2526 = vmatpush1.bf16.msra.mxu1 %v2525_v46  ;;  %v2565_v46 = vpack.c.bf16 %v2274_v43, %v2272_v62  ;;  %v1775_v62 = vld [vmem:[%s3943_s5 + $0x60] sm:$0xff]  ;;  %v1776_v43 = vld [vmem:[%s3943_s5 + $0x68] sm:$0xff] }
 0x2a3   : > { %2528 = vmatprep.subr.bf16.mxu1 %v2527_v21  ;;  %v2567_v21 = vpack.c.bf16 %v2279_v45, %v2277_v44  ;;  %v2601_v44 = vpack.c.bf16 %v1776_v43, %v1775_v62  ;;  %v1803_v62 = vld [vmem:[%s3944_s6] sm:$0x1] }
 0x2a6   : > { %2530 = vmatpush1.bf16.msra.mxu1 %v2529_v51  ;;  %v2569_v51 = vpack.c.bf16 %v2278_v48, %v2276_v47 }
 0x2a7   : > { %2532 = vmatprep.subr.bf16.mxu1 %v2531_v52  ;;  %v2571_v52 = vpack.c.bf16 %v2283_v50, %v2281_v49 }
 0x2aa   : > { %2534 = vmatpush1.bf16.msra.mxu1 %v2533_v57  ;;  %v2284_v57 = vld [vmem:[%s3941_s3 + $0x4a0] sm:$0xff] }
 0x2ab   : > { %2536 = vmatprep.subr.bf16.mxu1 %v2535_v58 }
 0x2ae   : > { %2538 = vmatpush1.bf16.msra.mxu1 %v2537_v1 }
 0x2af   : > { %2540 = vmatprep.subr.bf16.mxu1 %v2539_v2 }
 0x2b2   : > { %2542 = vmatpush1.bf16.msra.mxu1 %v2541_v6  ;;  %v1781_v6 = vld [vmem:[%s3943_s5 + $0x90] sm:$0xff] }
 0x2b3   : > { %2544 = vmatprep.subr.bf16.mxu1 %v2543_v8  ;;  %v1782_v8 = vld [vmem:[%s3943_s5 + $0x98] sm:$0xff] }
 0x2b4   : > { %v2579_v11 = vpack.c.bf16 %v1782_v8, %v1781_v6 }
 0x2b6   : > { %2546 = vmatpush1.bf16.msra.mxu1 %v2545_v12  ;;  %v1765_v12 = vld [vmem:[%s3943_s5 + $0x10] sm:$0xff] }
 0x2b7   : > { %1540 = vmatprep.subr.mxu1 %v2254_v10  ;;  %v1766_v10 = vld [vmem:[%s3943_s5 + $0x18] sm:$0xff] }
 0x2b8   : > { %v2581_v17 = vpack.c.bf16 %v1766_v10, %v1765_v12  ;;  %v1795_v12 = vld [vmem:[%s3943_s5 + $0x100] sm:$0xff]  ;;  %v1796_v10 = vld [vmem:[%s3943_s5 + $0x108] sm:$0xff] }
 0x2ba   : > { %1541 = vmatpush1.msra.mxu1 %v2253_v20  ;;  %v1785_v20 = vld [vmem:[%s3943_s5 + $0xb0] sm:$0xff] }
 0x2bb   : > { %2255 = vmatmul.mubr.msk.f32.vlgmr.msra.gmra.mrb[0].mxu1 %vm1220_vm11, %v3364_v13  ;;  %2548 = vmatprep.subr.bf16.mxu1 %v2547_v22  ;;  %v2271_v13 = vld [vmem:[%s3941_s3 + $0x438] sm:$0xff] }
 0x2bc   : > { %2550 = vmatpush1.bf16.msra.mxu1 %v2549_v23  ;;  %1685 = vmatprep.mubr.f32.mxu1 %v2784_v7  ;;  %v2559_v28 = vpack.c.bf16 %v2271_v13, %v2269_v35  ;;  %v1786_v22 = vld [vmem:[%s3943_s5 + $0xb8] sm:$0xff]  ;;  %v2585_v23 = vpack.c.bf16 %v1768_v19, %v1767_v18  ;;  %v1789_v35 = vld [vmem:[%s3943_s5 + $0xd0] sm:$0xff] }
 0x2bd   : > { %2552 = vmatprep.subr.bf16.mxu1 %v2551_v24  ;;  %v2587_v24 = vpack.c.bf16 %v1786_v22, %v1785_v20  ;;  %v1790_v13 = vld [vmem:[%s3943_s5 + $0xd8] sm:$0xff]  ;;  %v1797_v18 = vld [vmem:[%s3943_s5 + $0x110] sm:$0xff] }
 0x2be   : > { %v1798_v19 = vld [vmem:[%s3943_s5 + $0x118] sm:$0xff] }
 0x2bf   : > { %v2611_v22 = vpack.c.bf16 %v1798_v19, %v1797_v18 }
 0x2c0   : > { %2554 = vmatpush1.bf16.msra.mxu1 %v2553_v31  ;;  %v2589_v31 = vpack.c.bf16 %v1770_v27, %v1769_v25  ;;  %v1801_v27 = vld [vmem:[%s3943_s5 + $0x130] sm:$0xff] }
 0x2c1   : > { %2556 = vmatprep.subr.bf16.mxu1 %v2555_v32  ;;  %v2591_v32 = vpack.c.bf16 %v1788_v30, %v1787_v29  ;;  %v1802_v29 = vld [vmem:[%s3943_s5 + $0x138] sm:$0xff] }
 0x2c2   : > { %v2617_v30 = vpack.c.bf16 %v1802_v29, %v1801_v27 }
 0x2c4   : > { %2558 = vmatpush1.bf16.msra.mxu1 %v2557_v36  ;;  %v2593_v36 = vpack.c.bf16 %v1772_v34, %v1771_v33  ;;  %v1949_v34 = vld [vmem:[%s3945_s7 + $0x10] sm:$0xff] }
 0x2c5   : > { %2560 = vmatprep.subr.bf16.mxu1 %v2559_v28  ;;  %v2595_v28 = vpack.c.bf16 %v1790_v13, %v1789_v35  ;;  %v1950_v35 = vld [vmem:[%s3945_s7 + $0x18] sm:$0xff] }
 0x2c6   : > { %v2623_v13 = vpack.c.bf16 %v1950_v35, %v1949_v34 }
 0x2c8   : > { %2562 = vmatpush1.bf16.msra.mxu1 %v2561_v42  ;;  %v2597_v42 = vpack.c.bf16 %v1774_v38, %v1773_v37  ;;  %v1953_v37 = vld [vmem:[%s3945_s7 + $0x30] sm:$0xff]  ;;  %v1954_v38 = vld [vmem:[%s3945_s7 + $0x38] sm:$0xff] }
 0x2c9   : > { %2564 = vmatprep.subr.bf16.mxu1 %v2563_v61  ;;  %v2599_v61 = vpack.c.bf16 %v1792_v41, %v1791_v40  ;;  %v2629_v40 = vpack.c.bf16 %v1954_v38, %v1953_v37 }
 0x2cc   : > { %2566 = vmatpush1.bf16.msra.mxu1 %v2565_v46 }
 0x2cd   : > { %2568 = vmatprep.subr.bf16.mxu1 %v2567_v21 }
 0x2d0   : > { %2570 = vmatpush1.bf16.msra.mxu1 %v2569_v51 }
 0x2d1   : > { %2572 = vmatprep.subr.bf16.mxu1 %v2571_v52  ;;  %v1793_v52 = vld [vmem:[%s3943_s5 + $0xf0] sm:$0xff] }
 0x2d4   : > { %2574 = vmatpush1.bf16.msra.mxu1 %v2573_v55  ;;  %v2603_v55 = vpack.c.bf16 %v1794_v53, %v1793_v52 }
 0x2d5   : > { %1649 = vmatprep.subr.mxu1 %v2285_v56  ;;  %v1777_v56 = vld [vmem:[%s3943_s5 + $0x70] sm:$0xff] }
 0x2d8   : > { %1650 = vmatpush1.msra.mxu1 %v2284_v57  ;;  %v1778_v57 = vld [vmem:[%s3943_s5 + $0x78] sm:$0xff] }
 0x2d9   : > { %2286 = vmatmul.mubr.msk.f32.vlgmr.msra.gmra.mrb[0].mxu1 %vm1220_vm11, %v3367_v14  ;;  %v1779_v14 = vld [vmem:[%s3943_s5 + $0x80] sm:$0xff] }
 0x2da   : > { %v2575_v26 = vpack.c.bf16 %v1780_v3, %v1779_v14  ;;  %v2797_v14 = vmov 0.0|0.0  }
 0x2dc   : > { %2576 = vmatprep.subr.bf16.mxu0 %v2575_v26 }
 0x2dd   : > { %2578 = vmatpush3.bf16.msra.mxu0 %v2577_v9 }
 0x2de   : > { %2580 = vmatprep.subr.bf16.mxu0 %v2579_v11 }
 0x2e1   : > { %2582 = vmatpush3.bf16.msra.mxu0 %v2581_v17  ;;  %v2608_v17 = vpack.c.bf16 %v1796_v10, %v1795_v12 }
 0x2e2   : > { %2584 = vmatprep.subr.bf16.mxu0 %v2583_v39 }
 0x2e5   : > { %2586 = vmatpush3.bf16.msra.mxu0 %v2585_v23  ;;  %v1799_v23 = vld [vmem:[%s3943_s5 + $0x120] sm:$0xff] }
 0x2e6   : > { %2588 = vmatprep.subr.bf16.mxu0 %v2587_v24  ;;  %v1800_v24 = vld [vmem:[%s3943_s5 + $0x128] sm:$0xff] }
 0x2e7   : > { %v2614_v25 = vpack.c.bf16 %v1800_v24, %v1799_v23 }
 0x2e9   : > { %2590 = vmatpush3.bf16.msra.mxu0 %v2589_v31  ;;  %v1947_v31 = vld [vmem:[%s3945_s7] sm:$0xff] }
 0x2ea   : > { %2592 = vmatprep.subr.bf16.mxu0 %v2591_v32  ;;  %v1948_v32 = vld [vmem:[%s3945_s7 + $0x8] sm:$0xff] }
 0x2eb   : > { %v2620_v33 = vpack.c.bf16 %v1948_v32, %v1947_v31 }
 0x2ed   : > { %2594 = vmatpush3.bf16.msra.mxu0 %v2593_v36  ;;  %v1952_v36 = vld [vmem:[%s3945_s7 + $0x28] sm:$0xff] }
 0x2ee   : > { %2596 = vmatprep.subr.bf16.mxu0 %v2595_v28 }
 0x2f1   : > { %2598 = vmatpush3.bf16.msra.mxu0 %v2597_v42 }
 0x2f2   : > { %2600 = vmatprep.subr.bf16.mxu0 %v2599_v61 }
 0x2f5   : > { %2602 = vmatpush3.bf16.msra.mxu0 %v2601_v44 }
 0x2f6   : > { %2604 = vmatprep.subr.bf16.mxu0 %v2603_v55 }
 0x3ac   : > { %v1687_v58 = vpop.f32.mrb[0].mxu1 }
 0x3ad   : > { %1695 = vrot.lane.b32.xlu0 %v1687_v58, %s3974_s29  ;;  %v1689_v59 = vpop.f32.mrb[1].mxu1 }
 0x3ae   : > { %1700 = vrot.lane.b32.xlu1 %v1689_v59, %s3974_s29 }
 0x41f   : > { %v1696_v60 = vpop.permute.xlu0 %1695 }
 0x420   : > { %v3715_v63 = vmax.f32 %v1687_v58, %v1696_v60  ;;  %v1701_v0 = vpop.permute.xlu1 %1700 }
 0x421   : > { %v1703_v1 = vmax.f32 %v1687_v58, %v1701_v0  ;;  %v1704_v2 = vmax.f32 %v1689_v59, %v1701_v0  ;;  %v2605_v58 = vpack.c.bf16 %v1778_v57, %v1777_v56 }
 0x422   : > { %1706 = vrot.lane.b32.xlu0 %v3715_v63, %s3974_s29  ;;  %1709 = vrot.lane.b32.xlu1 %v3715_v63, %s3975_s23 }
 0x423   : > { %2606 = vmatpush3.bf16.msra.mxu0 %v2605_v58 }
 0x424   : > { %2607 = vmatprep.subr.bf16.mxu0 %v2797_v14 }
 0x426   : > { %1716 = vrot.lane.b32.xlu1 %v1704_v2, %s3977_s21  ;;  %1714 = vrot.lane.b32.xlu0 %v1703_v1, %s3977_s21  ;;  %v2287_v2 = vld [vmem:[%s3942_s4] ss:$0 sm:$0xff]  ;;  %s2798_s21 = smov 32  }
 0x494   : > { %v1707_v45 = vpop.permute.xlu0 %1706  ;;  %v1710_v46 = vpop.permute.xlu1 %1709 }
 0x495   : > { %v1720_v21 = vsel %vm1054_vm5, %v3715_v63, %v1707_v45  ;;  %vm1761_vm5 = vcmask 916480  }
 0x496   : > { %v1721_v49 = vsel %vm1062_vm7, %v1720_v21, %v1710_v46  ;;  %vm2801_vm7 = vmmov 0   ;;  %v1955_v21 = vld [vmem:[%s3946_s8] sm:$0x1] }
 0x498   : > { %v1715_v47 = vpop.permute.xlu0 %1714  ;;  %v1717_v48 = vpop.permute.xlu1 %1716 }
 0x499   : > { %v1718_v50 = vsel %vm998_vm8, %v1715_v47, %v1717_v48  ;;  %vm1804_vm8 = vcmask 523264  }
 0x49a   : > { %v1722_v51 = vsel %vm1070_vm10, %v1721_v49, %v1718_v50 }
 0x49b   : > { %v1724_v54 = vrot.slane %v1722_v51, 1 }
 0x49d   : > { %v1726_v59 = vmax.f32 %v1722_v51, %v1724_v54 }
 0x49f   : > { %v1728_v60 = vrot.slane %v1726_v59, 1  ;;  %v1730_v63 = vrot.slane %v1726_v59, 2  ;;  %v1732_v0 = vrot.slane %v1726_v59, 3 }
 0x4a1   : > { %v1734_v1 = vsel %vm1129_vm1, %v1726_v59, %v1728_v60 }
 0x4a2   : > { %v1735_v3 = vsel %vm1131_vm2, %v1734_v1, %v1730_v63 }
 0x4a3   : > { %v1736_v4 = vsel %vm1133_vm3, %v1735_v3, %v1732_v0 }
 0x4a4   : > { %v1744_v26 = vadd.f32 %v2287_v2, %v1736_v4 }
 0x4a6   : > { %v1750_v5 = vrot.slane %v1744_v26, 2  ;;  %v1746_v6 = vrot.slane %v1744_v26, 1  ;;  %v1754_v8 = vrot.slane %v1744_v26, 3 }
 0x4a8   : > { %1751 = vrot.lane.b32.xlu1 %v1750_v5, %s2798_s21  ;;  %1747 = vrot.lane.b32.xlu0 %v1746_v6, %s2799_s22  ;;  %s2043_s21 = sshll.u32 %s324_s27, 4  ;;  %s3898_s21 = int_to_ptr.vmem [resolvable:$true] %s2043_s21 }
 0x4a9   : > { %s2720_s17 = scalar_lea.vmem %s3898_s21, 16  ;;  %p2727_p0 = scmp.lt.s32.totalorder %s3898_s21, %s2725_s24 }
 0x4aa   : > { %p2721_p11 = scmp.ne.s32.totalorder %s3898_s21, %s2720_s17  ;;  %p2728_p1 = scmp.lt.s32.totalorder %s2726_s25, %s2720_s17 }
 0x4ac   : > { %1755 = vrot.lane.b32.xlu0 %v1754_v8, %s2800_s28  ;;  %p2722_p12 = pnand %p2721_p11, %p2891_p5  ;;  %p2729_p2 = por %p2728_p1, %p2727_p0 }
 0x4ae   : > { %p2723_p13 = pneg %p2722_p12 }
 0x4b0   : > { %p2730_p3 = pnand %p2729_p2, %p2723_p13 }
 0x51a   : > { %v1748_v9 = vpop.permute.xlu0 %1747  ;;  %v1752_v11 = vpop.permute.xlu1 %1751 }
 0x51b   : > { %v1760_v15 = vsel %vm1759_vm0, %v1748_v9, %v1752_v11  ;;  %v1758_v20 = vsel %vm1078_vm12, %v1744_v26, %v1748_v9 }
 0x51e   : > { %v1756_v16 = vpop.permute.xlu0 %1755 }
 0x51f   : > { %v1762_v39 = vsel %vm1761_vm5, %v1760_v15, %v1756_v16 }
 0x520   : > { %1871 = vmatprep.mubr.f32.mxu0 %v1762_v39 }
 0x521   : > { %1872 = vmatmul.mubr.f32.vlgmr.msra.gmra.mrb[6].mxu0 %v1758_v20 }
 0x522   : > { %2609 = vmatpush3.bf16.msra.mxu0 %v2608_v17  ;;  %2363 = vmatprep.mubr.msk.f32.mxu0 %vm2801_vm7, %v2784_v7 }
 0x523   : > { %2610 = vmatprep.subr.bf16.mxu0 %v2797_v14 }
 0x526   : > { %2612 = vmatpush3.bf16.msra.mxu0 %v2611_v22 }
 0x527   : > { %2613 = vmatprep.subr.bf16.mxu0 %v2797_v14 }
 0x52a   : > { %2615 = vmatpush3.bf16.msra.mxu0 %v2614_v25 }
 0x52b   : > { %2616 = vmatprep.subr.bf16.mxu0 %v2797_v14 }
 0x52e   : > { %2618 = vmatpush3.bf16.msra.mxu0 %v2617_v30 }
 0x52f   : > { %2619 = vmatprep.subr.bf16.mxu0 %v2797_v14 }
 0x531   : > { %2364 = vmatmul.mubr.msk.f32.vlgmr.msra.gmra.mrb[8].mxu0 %vm1804_vm8, %v1756_v16 }
 0x532   : > { %2382 = vmatprep.mubr.msk.f32.mxu0 %vm2801_vm7, %v2784_v7  ;;  %2621 = vmatpush3.bf16.msra.mxu0 %v2620_v33  ;;  %v1951_v7 = vld [vmem:[%s3945_s7 + $0x20] sm:$0xff] }
 0x533   : > { %2622 = vmatprep.subr.bf16.mxu0 %v2797_v14  ;;  %v2626_v28 = vpack.c.bf16 %v1952_v36, %v1951_v7 }
 0x536   : > { %2624 = vmatpush3.bf16.msra.mxu0 %v2623_v13 }
 0x537   : > { %2625 = vmatprep.subr.bf16.mxu0 %v2797_v14 }
 0x53a   : > { %2627 = vmatpush3.bf16.msra.mxu0 %v2626_v28 }
 0x53b   : > { %2628 = vmatprep.subr.bf16.mxu0 %v2797_v14 }
 0x53e   : > { %2630 = vmatpush3.bf16.msra.mxu0 %v2629_v40 }
 0x5f4   : > { %v2326_v41 = vpop.f32.mrb[6].mxu0 }
 0x5f5   : > { %v2327_v42 = vpop.f32.mrb[7].mxu0 }
 0x5f6   : > { %v2328_v61 = vadd.f32 %v2327_v42, %v2326_v41 }
 0x5f8   : > { %v1874_v43 = vadd.f32 %v2328_v61, %v1803_v62 }
 0x604   : > { %v1943_v44 = vpop.f32.mrb[8].mxu0 }
 0x605   : > { %v1944_v45 = vadd.f32 %v1943_v44, %v1874_v43  ;;  %v2365_v46 = vpop.f32.mrb[9].mxu0 }
 0x607   : > { %2383 = vmatmul.mubr.msk.f32.vlgmr.msra.gmra.mrb[10].mxu0 %vm1804_vm8, %v1944_v45 }
 0x6da   : > { %v2025_v47 = vpop.f32.mrb[10].mxu0 }
 0x6db   : > { %v2026_v48 = vadd.f32 %v2025_v47, %v1955_v21  ;;  %v2384_v49 = vpop.f32.mrb[11].mxu0 }
 0x6dd   : > { %2029 = vst [vmem:[%s324_s27] sm:$0x1] %v2026_v48 }
 0x6de   : > { %2733 = shalt.err (!%p2730_p3)
}
 0x6df   : > { %s2734_s16 = scalar_lea.hbm %s3896_s26, 16  ;;  %s2738_s23 = scalar_lea.hbm %s3947_s9, 32 }
 0x6e0   : > { %p2735_p4 = scmp.ne.s32.totalorder %s3896_s26, %s2734_s16  ;;  %p2739_p9 = scmp.lt.u32.totalorder %s3896_s26, %s3947_s9 }
 0x6e1   : > { %p2740_p10 = scmp.lt.u32.totalorder %s2738_s23, %s2734_s16  ;;  %p2742_p12 = scmp.lt.u32.totalorder %s2734_s16, %s3896_s26 }
 0x6e2   : > { %p2736_p7 = pnand %p2735_p4, %p2891_p5 }
 0x6e3   : > { %p2741_p11 = por %p2740_p10, %p2739_p9 }
 0x6e4   : > { %p2737_p8 = pneg %p2736_p7 }
 0x6e5   : > { %p2743_p13 = por %p2742_p12, %p2741_p11 }
 0x6e7   : > { %p2744_p0 = pnand %p2743_p13, %p2737_p8 }
 0x6e9   : > { %2747 = shalt.err (!%p2744_p0)
}
 0x6ea   : > { %2663 = dma.vmem_to_hbm [thread:$0]  (%p2891_p5), %s3898_s21, 16, %s3896_s26, %s2031_s14  }
 0x6eb PF: > { %p2669_p1 = scmp.ge.s32.totalorder %s2782_s12, 2  ;;  %s2055_s22 = sand.u32 1, %s2770_s30  }
 0x6ec   : > { %s2056_s28 = scalar_lea.sflag [#allocation3], %s2055_s22 }
 0x6ed   : > { %p2666_p2 = pnand %p2669_p1, %p2895_p6 }
 0x6ef   : > { %2765 = dma.done.wait (!%p2666_p2), %s2056_s28, 16  }
 0x6f0   : > { %2767 = vsyncadd (!%p2666_p2), %s2056_s28, 4294967280  ;;  %p19_p3 = scmp.ge.s32.totalorder %s2878_s15, 4   ;;  %s3983_s30 = smov %s2774_s10 }
 0x6f1   : > { %s3984_s10 = smov %s2778_s11  ;;  %s3985_s11 = smov %s2889_s18 }
 0x6f2   : > { %s3986_s12 = smov %s2878_s15  ;;  %21 = sbr.rel (!%p19_p3) target bundleno = 6 (0x6), region = 99 }
 0x6f9   :  { %2060 = vsyncpa [#allocation3], 1 }
 0x6fa   :  { %2062 = vsyncpa [#allocation3 + $0x1], 1 }

</bundles_post_ra>
